<compile_context>
chip_gen: v5e
topology: v5e:2x2
jax: 0.10.0
libtpu: 0.0.40
codegen_flags: <defaults>
</compile_context>

<pallas_src>
import functools

import jax
import jax.numpy as jnp
import numpy as np
from jax.experimental import pallas as pl
from jax.experimental.pallas import tpu as pltpu

H1 = 1024          # fc1 out
H2 = 512           # fc2 out
NUM_OUT = 24       # fc3 out (true)
OUT_PAD = 128      # fc3 out padded to a full lane width


def _round_up(n, m):
    return ((n + m - 1) // m) * m


def _device_caps():
    """Returns (batch-tile cap, prefer >=2 grid steps for 2-TensorCore sharding)."""
    try:
        kind = jax.devices()[0].device_kind.lower()
    except Exception:
        return 1024, False
    if "v2" in kind or "v3" in kind:
        return 256, False          # small-VMEM generations: stay conservative
    if "v5 lite" in kind or "v5lite" in kind or "v5e" in kind:
        return 512, False          # v5e: MXU-bound already at TB <= 512
    if "7" in kind:
        return 1024, True          # v7x: 2 TensorCores per chip
    return 1024, False             # v6e / default


def _choose_tb(batch, cap, prefer_two_steps):
    """Pick the batch tile: minimize pad waste, prefer bigger tiles (fewer
    grid steps), and on v7x prefer tilings that yield >= 2 grid steps."""
    b8 = _round_up(batch, 8)
    cands = {min(b8, cap)}
    cands.update(t for t in (256, 512, 1024) if t <= cap)
    if prefer_two_steps:
        cands.add(min(cap, _round_up(pl.cdiv(b8, 2), 8)))

    def key(t):
        padded = _round_up(batch, t)
        waste = padded - batch
        steps = padded // t
        need_split = 1 if (prefer_two_steps and steps < 2) else 0
        return (waste, need_split, -t)

    return min(cands, key=key)


def _mlp_kernel(x_ref,                       # (TB, F)        f32 or bf16
                w1_ref, b1_ref,              # (F, 1024) bf16, (1, 1024) f32
                w2_ref, b2_ref,              # (1024, 512) bf16, (1, 512) f32
                w3_ref, b3_ref,              # (512, 128) bf16, (1, 128) f32
                out_ref,                     # (TB, 128) bf16
                *, a1, a2):                  # PReLU slopes baked as constants
    x = x_ref[...].astype(jnp.bfloat16)

    # ---- fc1 (+ folded bn1) + PReLU ---------------------------------------
    h = jnp.dot(x, w1_ref[...], preferred_element_type=jnp.float32)
    h = h + b1_ref[...]
    h = jnp.where(h > 0, h, a1 * h)
    # drop1: identity at inference

    # ---- fc2 (+ folded bn2) + PReLU ---------------------------------------
    h = jnp.dot(h.astype(jnp.bfloat16), w2_ref[...],
                preferred_element_type=jnp.float32)
    h = h + b2_ref[...]
    h = jnp.where(h > 0, h, a2 * h)
    # drop2: identity at inference

    # ---- fc3 (+ folded bn3), lane-padded to 128 ---------------------------
    h = jnp.dot(h.astype(jnp.bfloat16), w3_ref[...],
                preferred_element_type=jnp.float32)
    h = h + b3_ref[...]

    out_ref[...] = h.astype(out_ref.dtype)   # bf16 lane-dense writeback


@functools.partial(jax.jit, static_argnames=("a1", "a2"))
def baseline_model1_forward(x, kp, a1, a2):
    """x: (B, inputsize) f32. kp: kernel-ready params (prepare_kernel_params).
    Returns (B, 24) f32."""
    B, F = x.shape

    cap, two_core = _device_caps()
    TB = _choose_tb(B, cap, prefer_two_steps=(two_core and B >= 256))
    B_pad = _round_up(B, TB)

    if F >= 512:
        # Halve x HBM->VMEM traffic once the feature dim is big enough to matter.
        x = x.astype(jnp.bfloat16)
    if B_pad != B:
        x = jnp.pad(x, ((0, B_pad - B), (0, 0)))

    grid = (B_pad // TB,)

    out_pad = pl.pallas_call(
        functools.partial(_mlp_kernel, a1=a1, a2=a2),
        out_shape=jax.ShapeDtypeStruct((B_pad, OUT_PAD), jnp.bfloat16),
        grid=grid,
        in_specs=[
            pl.BlockSpec((TB, F), lambda i: (i, 0)),       # x tile (pipelined)
            # Weights/biases: constant index_map -> DMA'd once, VMEM-resident.
            pl.BlockSpec((F, H1), lambda i: (0, 0)),
            pl.BlockSpec((1, H1), lambda i: (0, 0)),
            pl.BlockSpec((H1, H2), lambda i: (0, 0)),
            pl.BlockSpec((1, H2), lambda i: (0, 0)),
            pl.BlockSpec((H2, OUT_PAD), lambda i: (0, 0)),
            pl.BlockSpec((1, OUT_PAD), lambda i: (0, 0)),
        ],
        out_specs=pl.BlockSpec((TB, OUT_PAD), lambda i: (i, 0)),
        compiler_params=pltpu.CompilerParams(
            dimension_semantics=("parallel",),
            vmem_limit_bytes=32 << 20,
        ),
    )(x, kp["w1"], kp["b1"], kp["w2"], kp["b2"], kp["w3"], kp["b3"])

    return out_pad[:B, :NUM_OUT].astype(jnp.float32)


# --------------------------------------------------------------------------
# Parameter construction / prep
# --------------------------------------------------------------------------
def _bn_affine(gamma, beta, mean, var, eps=1e-5):
    scale = gamma / jnp.sqrt(var + eps)
    shift = beta - mean * scale
    return scale, shift


def make_params(key, inputsize):
    """Deterministic parameter init matching BaselineModel1.__init__ shapes."""
    ks = jax.random.split(key, 12)

    def linear(kw, kb, fan_in, fan_out):
        # nn.Linear default init: U(-1/sqrt(fan_in), 1/sqrt(fan_in))
        bound = 1.0 / np.sqrt(fan_in)
        w = jax.random.uniform(kw, (fan_in, fan_out), jnp.float32, -bound, bound)
        b = jax.random.uniform(kb, (1, fan_out), jnp.float32, -bound, bound)
        return w, b

    w1, b1 = linear(ks[0], ks[1], inputsize, H1)
    w2, b2 = linear(ks[2], ks[3], H1, H2)
    w3, b3 = linear(ks[4], ks[5], H2, NUM_OUT)

    def bn(kmean, kvar, n):
        gamma = jnp.ones((1, n), jnp.float32)          # BN weight init = 1
        beta = jnp.zeros((1, n), jnp.float32)          # BN bias init = 0
        mean = 0.1 * jax.random.normal(kmean, (1, n), jnp.float32)
        var = 0.5 + jax.random.uniform(kvar, (1, n), jnp.float32)
        return _bn_affine(gamma, beta, mean, var)

    s1, t1 = bn(ks[6], ks[7], H1)
    s2, t2 = bn(ks[8], ks[9], H2)
    s3, t3 = bn(ks[10], ks[11], NUM_OUT)

    prelu = jnp.array([0.25, 0.25], jnp.float32)       # PReLU default a=0.25

    return dict(w1=w1, b1=b1, s1=s1, t1=t1,
                w2=w2, b2=b2, s2=s2, t2=t2,
                w3=w3, b3=b3, s3=s3, t3=t3,
                prelu=prelu)


def prepare_kernel_params(p):
    """Fold eval-mode BN into the Linear layers, cast weights to bf16, and
    zero-pad fc3 to 128 output lanes. Done once at model-load time."""
    def fold(w, b, s, t):
        wf = (w * s).astype(jnp.bfloat16)              # MXU operand
        bf = (b * s + t).astype(jnp.float32)           # f32 bias/affine
        return wf, bf

    w1, b1 = fold(p["w1"], p["b1"], p["s1"], p["t1"])
    w2, b2 = fold(p["w2"], p["b2"], p["s2"], p["t2"])
    w3, b3 = fold(p["w3"], p["b3"], p["s3"], p["t3"])

    # Lane-pad fc3: columns 24..127 are exactly zero; sliced off outside kernel.
    pad = OUT_PAD - w3.shape[1]
    w3 = jnp.pad(w3, ((0, 0), (0, pad)))
    b3 = jnp.pad(b3, ((0, 0), (0, pad)))

    a1 = float(p["prelu"][0])
    a2 = float(p["prelu"][1])

    kp = dict(w1=w1, b1=b1, w2=w2, b2=b2, w3=w3, b3=b3)
    return kp, a1, a2


# --------------------------------------------------------------------------
# Pure-JAX reference (full f32, unfused — matches the PyTorch module)
# --------------------------------------------------------------------------
def reference_forward(x, p):
    def prelu(h, a):
        return jnp.where(h > 0, h, a * h)
    h = x @ p["w1"] + p["b1"]
    h = h * p["s1"] + p["t1"]
    h = prelu(h, p["prelu"][0])
    h = h @ p["w2"] + p["b2"]
    h = h * p["s2"] + p["t2"]
    h = prelu(h, p["prelu"][1])
    h = h @ p["w3"] + p["b3"]
    h = h * p["s3"] + p["t3"]
    return h


if __name__ == "__main__":
    key = jax.random.PRNGKey(0)
    k_x, k_p = jax.random.split(key)

    B, inputsize = 8, 32
    x = jax.random.normal(k_x, (B, inputsize), jnp.float32)
    params = make_params(k_p, inputsize)
    kparams, a1, a2 = prepare_kernel_params(params)

    # Small-batch path (single tile, weight-DMA-bound by design).
    out = jax.block_until_ready(baseline_model1_forward(x, kparams, a1, a2))
    ref = reference_forward(x, params)
    assert out.shape == (B, NUM_OUT)
    # Tolerance is bf16-MXU level (weights/activations/output quantized to
    # bf16, f32 accumulation) vs. the full-f32 reference.
    np.testing.assert_allclose(np.asarray(out), np.asarray(ref),
                               rtol=5e-2, atol=5e-2)

    # Larger ragged batch: exercises the multi-step grid, pad-waste-aware tile
    # selection, batch padding, and the lane-padded bf16 output slice.
    B2 = 1300
    x2 = jax.random.normal(jax.random.PRNGKey(1), (B2, inputsize), jnp.float32)
    out2 = jax.block_until_ready(baseline_model1_forward(x2, kparams, a1, a2))
    ref2 = reference_forward(x2, params)
    assert out2.shape == (B2, NUM_OUT)
    np.testing.assert_allclose(np.asarray(out2), np.asarray(ref2),
                               rtol=5e-2, atol=5e-2)

    print("KERNEL_OK")
</pallas_src>

<mosaic_0001>
module attributes {stable_mosaic.version = 11 : i64} {
  func.func @_mlp_kernel(%arg0: i32, %arg1: memref<8x32xf32, #tpu.memory_space<vmem>>, %arg2: memref<32x1024xbf16, #tpu.memory_space<vmem>>, %arg3: memref<1x1024xf32, #tpu.memory_space<vmem>>, %arg4: memref<1024x512xbf16, #tpu.memory_space<vmem>>, %arg5: memref<1x512xf32, #tpu.memory_space<vmem>>, %arg6: memref<512x128xbf16, #tpu.memory_space<vmem>>, %arg7: memref<1x128xf32, #tpu.memory_space<vmem>>, %arg8: memref<8x128xbf16, #tpu.memory_space<vmem>>) attributes {dimension_semantics = [#tpu.dimension_semantics<parallel>], iteration_bounds = array<i64: 1>, scalar_prefetch = 0 : i64, scratch_operands = 0 : i64, tpu.core_type = #tpu.core_type<tc>, window_params = [{transform_indices = @transform_0, window_bounds = array<i64: 8, 32>}, {pipeline_mode = #tpu.pipeline_mode<synchronous>, transform_indices = @transform_1, window_bounds = array<i64: 32, 1024>}, {pipeline_mode = #tpu.pipeline_mode<synchronous>, transform_indices = @transform_2, window_bounds = array<i64: 1, 1024>}, {pipeline_mode = #tpu.pipeline_mode<synchronous>, transform_indices = @transform_3, window_bounds = array<i64: 1024, 512>}, {pipeline_mode = #tpu.pipeline_mode<synchronous>, transform_indices = @transform_4, window_bounds = array<i64: 1, 512>}, {pipeline_mode = #tpu.pipeline_mode<synchronous>, transform_indices = @transform_5, window_bounds = array<i64: 512, 128>}, {pipeline_mode = #tpu.pipeline_mode<synchronous>, transform_indices = @transform_6, window_bounds = array<i64: 1, 128>}, {transform_indices = @transform_7, window_bounds = array<i64: 8, 128>}]} {
    %c0 = arith.constant 0 : index
    %c0_0 = arith.constant 0 : index
    %0 = vector.load %arg1[%c0, %c0_0] : memref<8x32xf32, #tpu.memory_space<vmem>>, vector<8x32xf32>
    %1 = arith.truncf %0 : vector<8x32xf32> to vector<8x32xbf16>
    %c0_1 = arith.constant 0 : index
    %c0_2 = arith.constant 0 : index
    %2 = vector.load %arg2[%c0_1, %c0_2] : memref<32x1024xbf16, #tpu.memory_space<vmem>>, vector<32x1024xbf16>
    %cst = arith.constant dense<0.000000e+00> : vector<8x1024xf32>
    %3 = tpu.matmul %1, %2, %cst {dimension_numbers = #tpu.dot_dimension_numbers<[1], [0], [0], [1], [0, 0, 1, 1], [], []>} : vector<8x32xbf16>, vector<32x1024xbf16>, vector<8x1024xf32> -> vector<8x1024xf32>
    %c0_3 = arith.constant 0 : index
    %c0_4 = arith.constant 0 : index
    %4 = vector.load %arg3[%c0_3, %c0_4] : memref<1x1024xf32, #tpu.memory_space<vmem>>, vector<1x1024xf32>
    %5 = vector.broadcast %4 : vector<1x1024xf32> to vector<8x1024xf32>
    %6 = arith.addf %3, %5 : vector<8x1024xf32>
    %cst_5 = arith.constant 0.000000e+00 : f32
    %7 = vector.broadcast %cst_5 : f32 to vector<8x1024xf32>
    %8 = arith.cmpf ogt, %6, %7 : vector<8x1024xf32>
    %cst_6 = arith.constant 2.500000e-01 : f32
    %9 = vector.broadcast %cst_6 : f32 to vector<8x1024xf32>
    %10 = arith.mulf %9, %6 : vector<8x1024xf32>
    %11 = arith.select %8, %6, %10 : vector<8x1024xi1>, vector<8x1024xf32>
    %12 = arith.truncf %11 : vector<8x1024xf32> to vector<8x1024xbf16>
    %c0_7 = arith.constant 0 : index
    %c0_8 = arith.constant 0 : index
    %13 = vector.load %arg4[%c0_7, %c0_8] : memref<1024x512xbf16, #tpu.memory_space<vmem>>, vector<1024x512xbf16>
    %cst_9 = arith.constant dense<0.000000e+00> : vector<8x512xf32>
    %14 = tpu.matmul %12, %13, %cst_9 {dimension_numbers = #tpu.dot_dimension_numbers<[1], [0], [0], [1], [0, 0, 1, 1], [], []>} : vector<8x1024xbf16>, vector<1024x512xbf16>, vector<8x512xf32> -> vector<8x512xf32>
    %c0_10 = arith.constant 0 : index
    %c0_11 = arith.constant 0 : index
    %15 = vector.load %arg5[%c0_10, %c0_11] : memref<1x512xf32, #tpu.memory_space<vmem>>, vector<1x512xf32>
    %16 = vector.broadcast %15 : vector<1x512xf32> to vector<8x512xf32>
    %17 = arith.addf %14, %16 : vector<8x512xf32>
    %cst_12 = arith.constant 0.000000e+00 : f32
    %18 = vector.broadcast %cst_12 : f32 to vector<8x512xf32>
    %19 = arith.cmpf ogt, %17, %18 : vector<8x512xf32>
    %cst_13 = arith.constant 2.500000e-01 : f32
    %20 = vector.broadcast %cst_13 : f32 to vector<8x512xf32>
    %21 = arith.mulf %20, %17 : vector<8x512xf32>
    %22 = arith.select %19, %17, %21 : vector<8x512xi1>, vector<8x512xf32>
    %23 = arith.truncf %22 : vector<8x512xf32> to vector<8x512xbf16>
    %c0_14 = arith.constant 0 : index
    %c0_15 = arith.constant 0 : index
    %24 = vector.load %arg6[%c0_14, %c0_15] : memref<512x128xbf16, #tpu.memory_space<vmem>>, vector<512x128xbf16>
    %cst_16 = arith.constant dense<0.000000e+00> : vector<8x128xf32>
    %25 = tpu.matmul %23, %24, %cst_16 {dimension_numbers = #tpu.dot_dimension_numbers<[1], [0], [0], [1], [0, 0, 1, 1], [], []>} : vector<8x512xbf16>, vector<512x128xbf16>, vector<8x128xf32> -> vector<8x128xf32>
    %c0_17 = arith.constant 0 : index
    %c0_18 = arith.constant 0 : index
    %26 = vector.load %arg7[%c0_17, %c0_18] : memref<1x128xf32, #tpu.memory_space<vmem>>, vector<1x128xf32>
    %27 = vector.broadcast %26 : vector<1x128xf32> to vector<8x128xf32>
    %28 = arith.addf %25, %27 : vector<8x128xf32>
    %29 = arith.truncf %28 : vector<8x128xf32> to vector<8x128xbf16>
    %c0_19 = arith.constant 0 : index
    %c0_20 = arith.constant 0 : index
    %30 = vector.load %arg8[%c0_19, %c0_20] : memref<8x128xbf16, #tpu.memory_space<vmem>>, vector<8x128xbf16>
    tpu.vector_store %arg8[%c0_19, %c0_20], %29 {strides = array<i32>} : memref<8x128xbf16, #tpu.memory_space<vmem>>, vector<8x128xbf16>,
    return
  }
  func.func @transform_0(%arg0: i32) -> (i32, i32) {
    %c0_i32 = arith.constant 0 : i32
    %c0_i32_0 = arith.constant 0 : i32
    return %arg0, %c0_i32 : i32, i32
  }
  func.func @transform_1(%arg0: i32) -> (i32, i32) {
    %c0_i32 = arith.constant 0 : i32
    %c0_i32_0 = arith.constant 0 : i32
    %c0_i32_1 = arith.constant 0 : i32
    return %c0_i32, %c0_i32_0 : i32, i32
  }
  func.func @transform_2(%arg0: i32) -> (i32, i32) {
    %c0_i32 = arith.constant 0 : i32
    %c0_i32_0 = arith.constant 0 : i32
    %c0_i32_1 = arith.constant 0 : i32
    return %c0_i32, %c0_i32_0 : i32, i32
  }
  func.func @transform_3(%arg0: i32) -> (i32, i32) {
    %c0_i32 = arith.constant 0 : i32
    %c0_i32_0 = arith.constant 0 : i32
    %c0_i32_1 = arith.constant 0 : i32
    return %c0_i32, %c0_i32_0 : i32, i32
  }
  func.func @transform_4(%arg0: i32) -> (i32, i32) {
    %c0_i32 = arith.constant 0 : i32
    %c0_i32_0 = arith.constant 0 : i32
    %c0_i32_1 = arith.constant 0 : i32
    return %c0_i32, %c0_i32_0 : i32, i32
  }
  func.func @transform_5(%arg0: i32) -> (i32, i32) {
    %c0_i32 = arith.constant 0 : i32
    %c0_i32_0 = arith.constant 0 : i32
    %c0_i32_1 = arith.constant 0 : i32
    return %c0_i32, %c0_i32_0 : i32, i32
  }
  func.func @transform_6(%arg0: i32) -> (i32, i32) {
    %c0_i32 = arith.constant 0 : i32
    %c0_i32_0 = arith.constant 0 : i32
    %c0_i32_1 = arith.constant 0 : i32
    return %c0_i32, %c0_i32_0 : i32, i32
  }
  func.func @transform_7(%arg0: i32) -> (i32, i32) {
    %c0_i32 = arith.constant 0 : i32
    %c0_i32_0 = arith.constant 0 : i32
    return %arg0, %c0_i32 : i32, i32
  }
}

</mosaic_0001>

<bundles_post_ra>
// kernel: baseline_model1_forward.1
= control target key start
LH: loop header
LB: loop body
LE: loop exit
PB: predicated region body
PF: predicated region fallthrough
CT: control target
= control target key end

     0   :  { %12 = vsyncpa [#allocation3], 0  ;;  %s4552_s0 = inlined_call_operand.hbm [shape: f32[8,32], index: 0, kind: input, shape index: {}]   ;;  %s4553_s1 = inlined_call_operand.hbm [shape: bf16[32,1024], index: 1, kind: input, shape index: {}]   ;;  %s4554_s2 = inlined_call_operand.hbm [shape: f32[1,1024], index: 2, kind: input, shape index: {}]   ;;  %s4555_s3 = inlined_call_operand.hbm [shape: bf16[1024,512], index: 3, kind: input, shape index: {}]   ;;  %s4556_s4 = inlined_call_operand.hbm [shape: f32[1,512], index: 4, kind: input, shape index: {}]   ;;  %s4557_s5 = inlined_call_operand.hbm [shape: bf16[512,128], index: 5, kind: input, shape index: {}]   ;;  %s4558_s6 = inlined_call_operand.vmem [shape: f32[1,128], index: 6, kind: input, shape index: {}]   ;;  %s4559_s7 = inlined_call_operand.vmem [shape: bf16[8,128], index: 7, kind: output, shape index: {}]  }
   0x1   :  { %13 = vsyncpa [#allocation5], 0 }
   0x2   :  { %14 = vsyncpa [#allocation8], 0  ;;  %s31_s26 = sshll.u32 %s4553_s1, 4  ;;  %s32_s26 = int_to_ptr.hbm [resolvable:$true] %s31_s26 }
   0x3   :  { %15 = vsyncpa [#allocation11], 0  ;;  %s4364_s27 = smov [#allocation4]   ;;  %s55_s8 = sshll.u32 %s4555_s3, 4  ;;  %s56_s8 = int_to_ptr.hbm [resolvable:$true] %s55_s8 }
   0x4   :  { %s33_s28 = sshll.u32 %s4364_s27, 4  ;;  %s4365_s9 = smov 512   ;;  %s34_s28 = int_to_ptr.vmem [resolvable:$true] %s33_s28 }
   0x5   :  { %s4366_s10 = smov 32   ;;  %s4367_s11 = smov [#allocation7]  }
   0x6   :  { %39 = dma.hbm_to_vmem [thread:$0]  %s32_s26, 2048, %s34_s28, [#allocation5], %s4365_s9, %s4365_s9, %s4366_s10  }
   0x7   :  { %s57_s12 = sshll.u32 %s4367_s11, 4  ;;  %s4368_s13 = smov 256   ;;  %s58_s12 = int_to_ptr.vmem [resolvable:$true] %s57_s12 }
   0x8   :  { %s4369_s14 = smov 16   ;;  %s21_s16 = sshll.u32 %s4552_s0, 4  ;;  %s22_s16 = int_to_ptr.hbm [resolvable:$true] %s21_s16 }
   0x9   :  { %63 = dma.hbm_to_vmem [thread:$0]  %s56_s8, 32768, %s58_s12, [#allocation8], %s4368_s13, %s4368_s13, %s4369_s14  }
   0xa   :  { %s4370_s17 = smov [#allocation2]   ;;  %s45_s20 = sshll.u32 %s4554_s2, 4  ;;  %s46_s20 = int_to_ptr.hbm [resolvable:$true] %s45_s20 }
   0xb   :  { %s23_s18 = sshll.u32 %s4370_s17, 4  ;;  %s4371_s21 = smov [#allocation6]   ;;  %s24_s18 = int_to_ptr.vmem [resolvable:$true] %s23_s18 }
   0xc   :  { %26 = dma.hbm_to_vmem [thread:$0]  %s22_s16, 128, %s24_s18, [#allocation3]  }
   0xd   :  { %s47_s22 = sshll.u32 %s4371_s21, 4  ;;  %s69_s25 = sshll.u32 %s4556_s4, 4  ;;  %s48_s22 = int_to_ptr.vmem [resolvable:$true] %s47_s22  ;;  %s70_s25 = int_to_ptr.hbm [resolvable:$true] %s69_s25 }
   0xe   :  { %50 = dma.hbm_to_vmem [thread:$0]  %s46_s20, 128, %s48_s22, [#allocation5]  }
   0xf   :  { %s79_s27 = sshll.u32 %s4557_s5, 4  ;;  %s4372_s28 = smov [#allocation9]   ;;  %s80_s27 = int_to_ptr.hbm [resolvable:$true] %s79_s27 }
  0x10   :  { %s71_s29 = sshll.u32 %s4372_s28, 4  ;;  %s4373_s2 = smov [#allocation10]   ;;  %s72_s29 = int_to_ptr.vmem [resolvable:$true] %s71_s29 }
  0x11   :  { %74 = dma.hbm_to_vmem [thread:$0]  %s70_s25, 64, %s72_s29, [#allocation8]  }
  0x12   :  { %s81_s30 = sshll.u32 %s4373_s2, 4  ;;  %s4374_s8 = smov 64   ;;  %s82_s30 = int_to_ptr.vmem [resolvable:$true] %s81_s30 }
  0x13   :  { %s4375_s9 = smov 4  }
  0x14   :  { %87 = dma.hbm_to_vmem [thread:$0]  %s80_s27, 4096, %s82_s30, [#allocation11], %s4374_s8, %s4374_s8, %s4375_s9  }
  0x15   :  { %4356 = dma.done.wait [#allocation3], 128  }
  0x16   :  { %4357 = vsyncadd [#allocation3], 4294967168 }
  0x17   :  { %4358 = dma.done.wait [#allocation5], 2176  }
  0x18   :  { %4359 = vsyncadd [#allocation5], 4294965120 }
  0x19   :  { %4360 = dma.done.wait [#allocation8], 32832  }
  0x1a   :  { %4361 = vsyncadd [#allocation8], 4294934464 }
  0x1b   :  { %4362 = dma.done.wait [#allocation11], 4096  }
  0x1c   :  { %4363 = vsyncadd [#allocation11], 4294963200  ;;  %v2705_v0 = vld [vmem:[#allocation4 + $0x40] sm:$0xf]  ;;  %v3903_v2 = vld [vmem:[#allocation4 + $0x44] sm:$0xf] }
  0x1d   :  { %v3907_v1 = vld [vmem:[#allocation4 + $0x5c] sm:$0xf0]  ;;  %v2707_v4 = vld [vmem:[#allocation4 + $0x60] sm:$0xf0]  ;;  %v2713_v5 = vld [vmem:[#allocation4 + $0x48] sm:$0xf] }
  0x1e   :  { %v2706_v3 = vor.u32 %v3907_v1, %v2705_v0  ;;  %v3908_v6 = vld [vmem:[#allocation4 + $0x64] sm:$0xf0]  ;;  %v2710_v7 = vor.u32 %v3903_v2, %v2707_v4  ;;  %v3904_v9 = vld [vmem:[#allocation4 + $0x4c] sm:$0xf]  ;;  %v2673_v11 = vld [vmem:[#allocation4] sm:$0xf] }
  0x1f   :  { %v2714_v8 = vor.u32 %v3908_v6, %v2713_v5  ;;  %v2715_v10 = vld [vmem:[#allocation4 + $0x68] sm:$0xf0]  ;;  %v3899_v13 = vld [vmem:[#allocation4 + $0x1c] sm:$0xf0]  ;;  %v3895_v14 = vld [vmem:[#allocation4 + $0x4] sm:$0xf] }
  0x20   :  { %241 = vmatpush.bf16.msra.mxu0 %v2706_v3  ;;  %v2718_v12 = vor.u32 %v3904_v9, %v2715_v10  ;;  %v2675_v15 = vld [vmem:[#allocation4 + $0x20] sm:$0xf0]  ;;  %254 = vmatpush.bf16.msra.mxu1 %v2710_v7  ;;  %v2674_v16 = vor.u32 %v3899_v13, %v2673_v11  ;;  %v2681_v18 = vld [vmem:[#allocation4 + $0x8] sm:$0xf]  ;;  %v3896_v20 = vld [vmem:[#allocation4 + $0xc] sm:$0xf] }
  0x21   :  { %267 = vmatpush.bf16.msra.mxu2 %v2714_v8  ;;  %v2678_v17 = vor.u32 %v3895_v14, %v2675_v15  ;;  %v3900_v19 = vld [vmem:[#allocation4 + $0x24] sm:$0xf0]  ;;  %v2683_v22 = vld [vmem:[#allocation4 + $0x28] sm:$0xf0]  ;;  %v115_v23 = vld [vmem:[#allocation2] sm:$0xff]  ;;  %vm231_vm0 = vcmask 261120  }
  0x22   :  { %280 = vmatpush.bf16.msra.mxu3 %v2718_v12  ;;  %v2682_v21 = vor.u32 %v3900_v19, %v2681_v18  ;;  %v2721_v24 = vld [vmem:[#allocation4 + $0x50] sm:$0xf]  ;;  %v2686_v25 = vor.u32 %v3896_v20, %v2683_v22  ;;  %v4434_v26 = vpack.c.bf16 %v115_v23, %v115_v23  ;;  %v3905_v28 = vld [vmem:[#allocation4 + $0x54] sm:$0xf]  ;;  %v2729_v32 = vld [vmem:[#allocation4 + $0x58] sm:$0xf] }
  0x23   :  { %v3909_v27 = vld [vmem:[#allocation4 + $0x6c] sm:$0xf0]  ;;  %v2723_v29 = vld [vmem:[#allocation4 + $0x70] sm:$0xf0]  ;;  %v3910_v33 = vld [vmem:[#allocation4 + $0x74] sm:$0xf0] }
  0x24   :  { %242 = vmatpush.bf16.msra.mxu0 %v2674_v16  ;;  %v2722_v30 = vor.u32 %v3909_v27, %v2721_v24  ;;  %v2726_v31 = vor.u32 %v3905_v28, %v2723_v29  ;;  %v3906_v34 = vld [vmem:[#allocation4 + $0x5c] sm:$0xf]  ;;  %255 = vmatpush.bf16.msra.mxu1 %v2678_v17  ;;  %v2730_v35 = vor.u32 %v3910_v33, %v2729_v32  ;;  %v2689_v37 = vld [vmem:[#allocation4 + $0x10] sm:$0xf]  ;;  %v3897_v41 = vld [vmem:[#allocation4 + $0x14] sm:$0xf] }
  0x25   :  { %268 = vmatpush.bf16.msra.mxu2 %v2682_v21  ;;  %v2731_v36 = vld [vmem:[#allocation4 + $0x78] sm:$0xf0]  ;;  %v3901_v38 = vld [vmem:[#allocation4 + $0x2c] sm:$0xf0]  ;;  %v2691_v42 = vld [vmem:[#allocation4 + $0x30] sm:$0xf0] }
  0x26   :  { %281 = vmatpush.bf16.msra.mxu3 %v2686_v25  ;;  %v2734_v39 = vor.u32 %v3906_v34, %v2731_v36  ;;  %v2690_v40 = vor.u32 %v3901_v38, %v2689_v37  ;;  %v2697_v43 = vld [vmem:[#allocation4 + $0x18] sm:$0xf]  ;;  %v2694_v44 = vor.u32 %v3897_v41, %v2691_v42  ;;  %v3898_v46 = vld [vmem:[#allocation4 + $0x1c] sm:$0xf]  ;;  %v2857_v48 = vld [vmem:[#allocation7 + $0xe0] sm:$0xf] }
  0x27   :  { %2735 = vmatmul.msk.bf16.vlgmr.msra.gmra.mxu0 %vm231_vm0, %v4434_v26  ;;  %v3902_v45 = vld [vmem:[#allocation4 + $0x34] sm:$0xf0]  ;;  %v2699_v47 = vld [vmem:[#allocation4 + $0x38] sm:$0xf0]  ;;  %2736 = vmatmul.msk.bf16.vlgmr.msra.gmra.mxu1 %vm231_vm0, %v4434_v26  ;;  %v2985_v50 = vld [vmem:[#allocation7 + $0x1e0] sm:$0xf] }
  0x28   :  { %293 = vmatpush.bf16.msrb.mxu0 %v2722_v30  ;;  %306 = vmatpush.bf16.msrb.mxu1 %v2726_v31  ;;  %v3941_v49 = vld [vmem:[#allocation7 + $0xec] sm:$0xf0]  ;;  %v2698_v51 = vor.u32 %v3902_v45, %v2697_v43  ;;  %v2841_v54 = vld [vmem:[#allocation7 + $0xc0] sm:$0xf]  ;;  %v2702_v56 = vor.u32 %v3898_v46, %v2699_v47 }
  0x29   :  { %2737 = vmatmul.msk.bf16.vlgmr.msra.gmra.mxu2 %vm231_vm0, %v4434_v26  ;;  %2738 = vmatmul.msk.bf16.vlgmr.msra.gmra.mxu3 %vm231_vm0, %v4434_v26  ;;  %v2858_v52 = vor.u32 %v3941_v49, %v2857_v48  ;;  %v3973_v53 = vld [vmem:[#allocation7 + $0x1ec] sm:$0xf0]  ;;  %v2969_v58 = vld [vmem:[#allocation7 + $0x1c0] sm:$0xf] }
  0x2a   :  { %319 = vmatpush.bf16.msrb.mxu2 %v2730_v35  ;;  %v3937_v55 = vld [vmem:[#allocation7 + $0xcc] sm:$0xf0]  ;;  %332 = vmatpush.bf16.msrb.mxu3 %v2734_v39  ;;  %v2986_v57 = vor.u32 %v3973_v53, %v2985_v50  ;;  %v3113_v60 = vld [vmem:[#allocation7 + $0x2e0] sm:$0xf] }
  0x2b   :  { %v3969_v59 = vld [vmem:[#allocation7 + $0x1cc] sm:$0xf0]  ;;  %v2842_v61 = vor.u32 %v3937_v55, %v2841_v54  ;;  %v3241_v63 = vld [vmem:[#allocation7 + $0x3e0] sm:$0xf] }
  0x2c   :  { %294 = vmatpush.bf16.msrb.mxu0 %v2690_v40  ;;  %307 = vmatpush.bf16.msrb.mxu1 %v2694_v44  ;;  %v4005_v62 = vld [vmem:[#allocation7 + $0x2ec] sm:$0xf0]  ;;  %v2970_v1 = vor.u32 %v3969_v59, %v2969_v58  ;;  %v2825_v4 = vld [vmem:[#allocation7 + $0xa0] sm:$0xf] }
  0x2d   :  { %v4037_v0 = vld [vmem:[#allocation7 + $0x3ec] sm:$0xf0]  ;;  %v3114_v2 = vor.u32 %v4005_v62, %v3113_v60  ;;  %v2953_v6 = vld [vmem:[#allocation7 + $0x1a0] sm:$0xf] }
  0x2e   :  { %v3242_v3 = vor.u32 %v4037_v0, %v3241_v63  ;;  %v3933_v5 = vld [vmem:[#allocation7 + $0xac] sm:$0xf0]  ;;  %320 = vmatpush.bf16.msrb.mxu2 %v2698_v51  ;;  %v3097_v8 = vld [vmem:[#allocation7 + $0x2c0] sm:$0xf]  ;;  %333 = vmatpush.bf16.msrb.mxu3 %v2702_v56 }
  0x2f   :  { %v3965_v7 = vld [vmem:[#allocation7 + $0x1ac] sm:$0xf0]  ;;  %v3225_v11 = vld [vmem:[#allocation7 + $0x3c0] sm:$0xf]  ;;  %v2826_v13 = vor.u32 %v3933_v5, %v2825_v4 }
  0x30   :  { %1917 = vmatpush.bf16.msra.mxu0 %v2858_v52  ;;  %1930 = vmatpush.bf16.msra.mxu1 %v2986_v57  ;;  %v4001_v9 = vld [vmem:[#allocation7 + $0x2cc] sm:$0xf0]  ;;  %v2954_v15 = vor.u32 %v3965_v7, %v2953_v6  ;;  %v3081_v16 = vld [vmem:[#allocation7 + $0x2a0] sm:$0xf] }
  0x31   :  { %v3098_v10 = vor.u32 %v4001_v9, %v3097_v8  ;;  %v4033_v12 = vld [vmem:[#allocation7 + $0x3cc] sm:$0xf0]  ;;  %v3209_v18 = vld [vmem:[#allocation7 + $0x3a0] sm:$0xf] }
  0x32   :  { %1943 = vmatpush.bf16.msra.mxu2 %v3114_v2  ;;  %1956 = vmatpush.bf16.msra.mxu3 %v3242_v3  ;;  %v3226_v14 = vor.u32 %v4033_v12, %v3225_v11  ;;  %v3997_v17 = vld [vmem:[#allocation7 + $0x2ac] sm:$0xf0]  ;;  %v2809_v20 = vld [vmem:[#allocation7 + $0x80] sm:$0xf] }
  0x33   :  { %v4029_v19 = vld [vmem:[#allocation7 + $0x3ac] sm:$0xf0]  ;;  %v2937_v22 = vld [vmem:[#allocation7 + $0x180] sm:$0xf]  ;;  %v3082_v23 = vor.u32 %v3997_v17, %v3081_v16 }
  0x34   :  { %1918 = vmatpush.bf16.msra.mxu0 %v2842_v61  ;;  %1931 = vmatpush.bf16.msra.mxu1 %v2970_v1  ;;  %v3929_v21 = vld [vmem:[#allocation7 + $0x8c] sm:$0xf0]  ;;  %v3210_v25 = vor.u32 %v4029_v19, %v3209_v18  ;;  %v3065_v27 = vld [vmem:[#allocation7 + $0x280] sm:$0xf] }
  0x35   :  { %v3961_v24 = vld [vmem:[#allocation7 + $0x18c] sm:$0xf0]  ;;  %v3193_v29 = vld [vmem:[#allocation7 + $0x380] sm:$0xf]  ;;  %v2810_v31 = vor.u32 %v3929_v21, %v2809_v20 }
  0x36   :  { %1944 = vmatpush.bf16.msra.mxu2 %v3098_v10  ;;  %1957 = vmatpush.bf16.msra.mxu3 %v3226_v14  ;;  %v3993_v28 = vld [vmem:[#allocation7 + $0x28c] sm:$0xf0]  ;;  %v2938_v32 = vor.u32 %v3961_v24, %v2937_v22  ;;  %v2793_v33 = vld [vmem:[#allocation7 + $0x60] sm:$0xf] }
  0x37   :  { %v4025_v30 = vld [vmem:[#allocation7 + $0x38c] sm:$0xf0]  ;;  %v2921_v35 = vld [vmem:[#allocation7 + $0x160] sm:$0xf]  ;;  %v3066_v36 = vor.u32 %v3993_v28, %v3065_v27  ;;  %2739 = vmatmul.msk.bf16.vlgmr.msrb.gmra.mxu0 %vm231_vm0, %v4434_v26  ;;  %2740 = vmatmul.msk.bf16.vlgmr.msrb.gmra.mxu1 %vm231_vm0, %v4434_v26 }
  0x38   :  { %1919 = vmatpush.bf16.msra.mxu0 %v2826_v13  ;;  %1932 = vmatpush.bf16.msra.mxu1 %v2954_v15  ;;  %v3925_v34 = vld [vmem:[#allocation7 + $0x6c] sm:$0xf0]  ;;  %v3194_v38 = vor.u32 %v4025_v30, %v3193_v29  ;;  %v3049_v39 = vld [vmem:[#allocation7 + $0x260] sm:$0xf] }
  0x39   :  { %v3957_v37 = vld [vmem:[#allocation7 + $0x16c] sm:$0xf0]  ;;  %2741 = vmatmul.msk.bf16.vlgmr.msrb.gmra.mxu2 %vm231_vm0, %v4434_v26  ;;  %v3177_v41 = vld [vmem:[#allocation7 + $0x360] sm:$0xf]  ;;  %2742 = vmatmul.msk.bf16.vlgmr.msrb.gmra.mxu3 %vm231_vm0, %v4434_v26  ;;  %v2794_v43 = vor.u32 %v3925_v34, %v2793_v33 }
  0x3a   :  { %1945 = vmatpush.bf16.msra.mxu2 %v3082_v23  ;;  %1958 = vmatpush.bf16.msra.mxu3 %v3210_v25  ;;  %v3989_v40 = vld [vmem:[#allocation7 + $0x26c] sm:$0xf0]  ;;  %v2922_v44 = vor.u32 %v3957_v37, %v2921_v35  ;;  %v2777_v45 = vld [vmem:[#allocation7 + $0x40] sm:$0xf] }
  0x3b   :  { %v4021_v42 = vld [vmem:[#allocation7 + $0x36c] sm:$0xf0]  ;;  %v2905_v47 = vld [vmem:[#allocation7 + $0x140] sm:$0xf]  ;;  %v3050_v48 = vor.u32 %v3989_v40, %v3049_v39 }
  0x3c   :  { %1920 = vmatpush.bf16.msra.mxu0 %v2810_v31  ;;  %1933 = vmatpush.bf16.msra.mxu1 %v2938_v32  ;;  %v3921_v46 = vld [vmem:[#allocation7 + $0x4c] sm:$0xf0]  ;;  %v3178_v50 = vor.u32 %v4021_v42, %v3177_v41  ;;  %v3033_v51 = vld [vmem:[#allocation7 + $0x240] sm:$0xf] }
  0x3d   :  { %v3953_v49 = vld [vmem:[#allocation7 + $0x14c] sm:$0xf0]  ;;  %v3161_v53 = vld [vmem:[#allocation7 + $0x340] sm:$0xf]  ;;  %v2778_v55 = vor.u32 %v3921_v46, %v2777_v45 }
  0x3e   :  { %1946 = vmatpush.bf16.msra.mxu2 %v3066_v36  ;;  %1959 = vmatpush.bf16.msra.mxu3 %v3194_v38  ;;  %v3985_v52 = vld [vmem:[#allocation7 + $0x24c] sm:$0xf0]  ;;  %v2906_v26 = vor.u32 %v3953_v49, %v2905_v47  ;;  %v2761_v56 = vld [vmem:[#allocation7 + $0x20] sm:$0xf] }
  0x3f   :  { %v4017_v54 = vld [vmem:[#allocation7 + $0x34c] sm:$0xf0]  ;;  %v2889_v58 = vld [vmem:[#allocation7 + $0x120] sm:$0xf]  ;;  %v3034_v59 = vor.u32 %v3985_v52, %v3033_v51 }
  0x40   :  { %1921 = vmatpush.bf16.msra.mxu0 %v2794_v43  ;;  %1934 = vmatpush.bf16.msra.mxu1 %v2922_v44  ;;  %v3917_v57 = vld [vmem:[#allocation7 + $0x2c] sm:$0xf0]  ;;  %v3162_v61 = vor.u32 %v4017_v54, %v3161_v53  ;;  %v3017_v62 = vld [vmem:[#allocation7 + $0x220] sm:$0xf] }
  0x41   :  { %v3949_v60 = vld [vmem:[#allocation7 + $0x12c] sm:$0xf0]  ;;  %v3145_v0 = vld [vmem:[#allocation7 + $0x320] sm:$0xf]  ;;  %v2762_v2 = vor.u32 %v3917_v57, %v2761_v56 }
  0x42   :  { %1947 = vmatpush.bf16.msra.mxu2 %v3050_v48  ;;  %1960 = vmatpush.bf16.msra.mxu3 %v3178_v50  ;;  %v3981_v63 = vld [vmem:[#allocation7 + $0x22c] sm:$0xf0]  ;;  %v2745_v3 = vld [vmem:[#allocation7] sm:$0xf]  ;;  %v2890_v5 = vor.u32 %v3949_v60, %v2889_v58 }
  0x43   :  { %v4013_v1 = vld [vmem:[#allocation7 + $0x32c] sm:$0xf0]  ;;  %v2873_v6 = vld [vmem:[#allocation7 + $0x100] sm:$0xf]  ;;  %v3018_v9 = vor.u32 %v3981_v63, %v3017_v62 }
  0x44   :  { %1922 = vmatpush.bf16.msra.mxu0 %v2778_v55  ;;  %v3913_v4 = vld [vmem:[#allocation7 + $0xc] sm:$0xf0]  ;;  %1935 = vmatpush.bf16.msra.mxu1 %v2906_v26  ;;  %v3369_v8 = vld [vmem:[#allocation7 + $0x4e0] sm:$0xf]  ;;  %v3146_v13 = vor.u32 %v4013_v1, %v3145_v0 }
  0x45   :  { %v3945_v7 = vld [vmem:[#allocation7 + $0x10c] sm:$0xf0]  ;;  %v3497_v11 = vld [vmem:[#allocation7 + $0x5e0] sm:$0xf]  ;;  %v2746_v17 = vor.u32 %v3913_v4, %v2745_v3 }
  0x46   :  { %1948 = vmatpush.bf16.msra.mxu2 %v3034_v59  ;;  %1961 = vmatpush.bf16.msra.mxu3 %v3162_v61  ;;  %v4069_v10 = vld [vmem:[#allocation7 + $0x4ec] sm:$0xf0]  ;;  %v3001_v14 = vld [vmem:[#allocation7 + $0x200] sm:$0xf]  ;;  %v2874_v21 = vor.u32 %v3945_v7, %v2873_v6 }
  0x47   :  { %v4101_v12 = vld [vmem:[#allocation7 + $0x5ec] sm:$0xf0]  ;;  %v3129_v16 = vld [vmem:[#allocation7 + $0x300] sm:$0xf]  ;;  %v3370_v22 = vor.u32 %v4069_v10, %v3369_v8 }
  0x48   :  { %v3977_v15 = vld [vmem:[#allocation7 + $0x20c] sm:$0xf0]  ;;  %1923 = vmatpush.bf16.msra.mxu0 %v2762_v2  ;;  %v3625_v19 = vld [vmem:[#allocation7 + $0x6e0] sm:$0xf]  ;;  %1936 = vmatpush.bf16.msra.mxu1 %v2890_v5  ;;  %v3498_v25 = vor.u32 %v4101_v12, %v3497_v11 }
  0x49   :  { %v4009_v18 = vld [vmem:[#allocation7 + $0x30c] sm:$0xf0]  ;;  %v3753_v23 = vld [vmem:[#allocation7 + $0x7e0] sm:$0xf]  ;;  %v3002_v29 = vor.u32 %v3977_v15, %v3001_v14 }
  0x4a   :  { %v4133_v20 = vld [vmem:[#allocation7 + $0x6ec] sm:$0xf0]  ;;  %1949 = vmatpush.bf16.msra.mxu2 %v3018_v9  ;;  %1962 = vmatpush.bf16.msra.mxu3 %v3146_v13  ;;  %v3353_v27 = vld [vmem:[#allocation7 + $0x4c0] sm:$0xf]  ;;  %v3130_v32 = vor.u32 %v4009_v18, %v3129_v16 }
  0x4b   :  { %v4165_v24 = vld [vmem:[#allocation7 + $0x7ec] sm:$0xf0]  ;;  %v3481_v30 = vld [vmem:[#allocation7 + $0x5c0] sm:$0xf]  ;;  %v3626_v33 = vor.u32 %v4133_v20, %v3625_v19 }
  0x4c   :  { %v4065_v28 = vld [vmem:[#allocation7 + $0x4cc] sm:$0xf0]  ;;  %1924 = vmatpush.bf16.msra.mxu0 %v2746_v17  ;;  %v3754_v34 = vor.u32 %v4165_v24, %v3753_v23  ;;  %v3609_v35 = vld [vmem:[#allocation7 + $0x6c0] sm:$0xf]  ;;  %1937 = vmatpush.bf16.msra.mxu1 %v2874_v21 }
  0x4d   :  { %v4097_v31 = vld [vmem:[#allocation7 + $0x5cc] sm:$0xf0]  ;;  %v3354_v37 = vor.u32 %v4065_v28, %v3353_v27  ;;  %v3737_v38 = vld [vmem:[#allocation7 + $0x7c0] sm:$0xf] }
  0x4e   :  { %v4129_v36 = vld [vmem:[#allocation7 + $0x6cc] sm:$0xf0]  ;;  %v3482_v40 = vor.u32 %v4097_v31, %v3481_v30  ;;  %1950 = vmatpush.bf16.msra.mxu2 %v3002_v29  ;;  %v3337_v41 = vld [vmem:[#allocation7 + $0x4a0] sm:$0xf]  ;;  %1963 = vmatpush.bf16.msra.mxu3 %v3130_v32 }
  0x4f   :  { %v4161_v39 = vld [vmem:[#allocation7 + $0x7cc] sm:$0xf0]  ;;  %v3465_v43 = vld [vmem:[#allocation7 + $0x5a0] sm:$0xf]  ;;  %v3610_v45 = vor.u32 %v4129_v36, %v3609_v35 }
  0x50   :  { %1969 = vmatpush.bf16.msrb.mxu0 %v3370_v22  ;;  %1982 = vmatpush.bf16.msrb.mxu1 %v3498_v25  ;;  %v4061_v42 = vld [vmem:[#allocation7 + $0x4ac] sm:$0xf0]  ;;  %v3738_v46 = vor.u32 %v4161_v39, %v3737_v38  ;;  %v3593_v47 = vld [vmem:[#allocation7 + $0x6a0] sm:$0xf] }
  0x51   :  { %v4093_v44 = vld [vmem:[#allocation7 + $0x5ac] sm:$0xf0]  ;;  %v3338_v49 = vor.u32 %v4061_v42, %v3337_v41  ;;  %v3721_v50 = vld [vmem:[#allocation7 + $0x7a0] sm:$0xf] }
  0x52   :  { %1995 = vmatpush.bf16.msrb.mxu2 %v3626_v33  ;;  %2008 = vmatpush.bf16.msrb.mxu3 %v3754_v34  ;;  %v4125_v48 = vld [vmem:[#allocation7 + $0x6ac] sm:$0xf0]  ;;  %v3466_v52 = vor.u32 %v4093_v44, %v3465_v43  ;;  %v3321_v53 = vld [vmem:[#allocation7 + $0x480] sm:$0xf] }
  0x53   :  { %v4157_v51 = vld [vmem:[#allocation7 + $0x7ac] sm:$0xf0]  ;;  %v3449_v55 = vld [vmem:[#allocation7 + $0x580] sm:$0xf]  ;;  %v3594_v56 = vor.u32 %v4125_v48, %v3593_v47 }
  0x54   :  { %1970 = vmatpush.bf16.msrb.mxu0 %v3354_v37  ;;  %1983 = vmatpush.bf16.msrb.mxu1 %v3482_v40  ;;  %v4057_v54 = vld [vmem:[#allocation7 + $0x48c] sm:$0xf0]  ;;  %v3722_v57 = vor.u32 %v4157_v51, %v3721_v50  ;;  %v3577_v58 = vld [vmem:[#allocation7 + $0x680] sm:$0xf]  ;;  %v4452_v51 = vld [vmem:[#allocation6] sm:$0xff] }
  0x55   :  { %v4089_v26 = vld [vmem:[#allocation7 + $0x58c] sm:$0xf0]  ;;  %v3322_v60 = vor.u32 %v4057_v54, %v3321_v53  ;;  %v3705_v61 = vld [vmem:[#allocation7 + $0x780] sm:$0xf]  ;;  %v136_v53 = vperm.slane %v4452_v51, 1 }
  0x56   :  { %1996 = vmatpush.bf16.msrb.mxu2 %v3610_v45  ;;  %2009 = vmatpush.bf16.msrb.mxu3 %v3738_v46  ;;  %v4121_v59 = vld [vmem:[#allocation7 + $0x68c] sm:$0xf0]  ;;  %v3450_v63 = vor.u32 %v4089_v26, %v3449_v55  ;;  %v3305_v0 = vld [vmem:[#allocation7 + $0x460] sm:$0xf] }
  0x57   :  { %v4153_v62 = vld [vmem:[#allocation7 + $0x78c] sm:$0xf0]  ;;  %v3433_v2 = vld [vmem:[#allocation7 + $0x560] sm:$0xf]  ;;  %v3578_v4 = vor.u32 %v4121_v59, %v3577_v58  ;;  %v2859_v58 = vld [vmem:[#allocation7 + $0xf0] sm:$0xf0] }
  0x58   :  { %1971 = vmatpush.bf16.msrb.mxu0 %v3338_v49  ;;  %1984 = vmatpush.bf16.msrb.mxu1 %v3466_v52  ;;  %v4053_v1 = vld [vmem:[#allocation7 + $0x46c] sm:$0xf0]  ;;  %v3706_v5 = vor.u32 %v4153_v62, %v3705_v61  ;;  %v3289_v8 = vld [vmem:[#allocation7 + $0x440] sm:$0xf]  ;;  %v135_v52 = vperm.slane %v4452_v51, 0 }
  0x59   :  { %v4085_v3 = vld [vmem:[#allocation7 + $0x56c] sm:$0xf0]  ;;  %v3306_v6 = vor.u32 %v4053_v1, %v3305_v0  ;;  %v3417_v10 = vld [vmem:[#allocation7 + $0x540] sm:$0xf]  ;;  %v2987_v61 = vld [vmem:[#allocation7 + $0x1f0] sm:$0xf0] }
  0x5a   :  { %1997 = vmatpush.bf16.msrb.mxu2 %v3594_v56  ;;  %2010 = vmatpush.bf16.msrb.mxu3 %v3722_v57  ;;  %v3434_v7 = vor.u32 %v4085_v3, %v3433_v2  ;;  %v4049_v9 = vld [vmem:[#allocation7 + $0x44c] sm:$0xf0]  ;;  %v3561_v14 = vld [vmem:[#allocation7 + $0x660] sm:$0xf]  ;;  %v3939_v57 = vld [vmem:[#allocation7 + $0xe4] sm:$0xf] }
  0x5b   :  { %v4081_v11 = vld [vmem:[#allocation7 + $0x54c] sm:$0xf0]  ;;  %v3290_v12 = vor.u32 %v4049_v9, %v3289_v8  ;;  %v3689_v16 = vld [vmem:[#allocation7 + $0x760] sm:$0xf]  ;;  %v138_v1 = vperm.slane %v4452_v51, 3  ;;  %v2862_v2 = vor.u32 %v3939_v57, %v2859_v58 }
  0x5c   :  { %1972 = vmatpush.bf16.msrb.mxu0 %v3322_v60  ;;  %1985 = vmatpush.bf16.msrb.mxu1 %v3450_v63  ;;  %v3418_v13 = vor.u32 %v4081_v11, %v3417_v10  ;;  %v4117_v15 = vld [vmem:[#allocation7 + $0x66c] sm:$0xf0]  ;;  %v3273_v20 = vld [vmem:[#allocation7 + $0x420] sm:$0xf]  ;;  %v3971_v60 = vld [vmem:[#allocation7 + $0x1e4] sm:$0xf] }
  0x5d   :  { %v3562_v17 = vor.u32 %v4117_v15, %v3561_v14  ;;  %v4149_v18 = vld [vmem:[#allocation7 + $0x76c] sm:$0xf0]  ;;  %v3401_v22 = vld [vmem:[#allocation7 + $0x520] sm:$0xf]  ;;  %v137_v63 = vperm.slane %v4452_v51, 2 }
  0x5e   :  { %1998 = vmatpush.bf16.msrb.mxu2 %v3578_v4  ;;  %2011 = vmatpush.bf16.msrb.mxu3 %v3706_v5  ;;  %v3690_v19 = vor.u32 %v4149_v18, %v3689_v16  ;;  %v4045_v21 = vld [vmem:[#allocation7 + $0x42c] sm:$0xf0]  ;;  %v3545_v27 = vld [vmem:[#allocation7 + $0x640] sm:$0xf]  ;;  %v2990_v5 = vor.u32 %v3971_v60, %v2987_v61  ;;  %v3967_v10 = vld [vmem:[#allocation7 + $0x1c4] sm:$0xf] }
  0x5f   :  { %v3274_v23 = vor.u32 %v4045_v21, %v3273_v20  ;;  %v4077_v24 = vld [vmem:[#allocation7 + $0x52c] sm:$0xf0]  ;;  %v3673_v29 = vld [vmem:[#allocation7 + $0x740] sm:$0xf]  ;;  %v2971_v11 = vld [vmem:[#allocation7 + $0x1d0] sm:$0xf0] }
  0x60   :  { %1973 = vmatpush.bf16.msrb.mxu0 %v3306_v6  ;;  %1986 = vmatpush.bf16.msrb.mxu1 %v3434_v7  ;;  %v3402_v25 = vor.u32 %v4077_v24, %v3401_v22  ;;  %v4113_v28 = vld [vmem:[#allocation7 + $0x64c] sm:$0xf0]  ;;  %v3257_v33 = vld [vmem:[#allocation7 + $0x400] sm:$0xf]  ;;  %v3935_v6 = vld [vmem:[#allocation7 + $0xc4] sm:$0xf] }
  0x61   :  { %v3546_v30 = vor.u32 %v4113_v28, %v3545_v27  ;;  %v4145_v31 = vld [vmem:[#allocation7 + $0x74c] sm:$0xf0]  ;;  %v3385_v35 = vld [vmem:[#allocation7 + $0x500] sm:$0xf]  ;;  %v2843_v7 = vld [vmem:[#allocation7 + $0xd0] sm:$0xf0] }
  0x62   :  { %1999 = vmatpush.bf16.msrb.mxu2 %v3562_v17  ;;  %2012 = vmatpush.bf16.msrb.mxu3 %v3690_v19  ;;  %v3674_v32 = vor.u32 %v4145_v31, %v3673_v29  ;;  %v4041_v34 = vld [vmem:[#allocation7 + $0x40c] sm:$0xf0]  ;;  %v3529_v39 = vld [vmem:[#allocation7 + $0x620] sm:$0xf]  ;;  %v4003_v15 = vld [vmem:[#allocation7 + $0x2e4] sm:$0xf]  ;;  %v2846_v18 = vor.u32 %v3935_v6, %v2843_v7 }
  0x63   :  { %v3258_v36 = vor.u32 %v4041_v34, %v3257_v33  ;;  %v4073_v37 = vld [vmem:[#allocation7 + $0x50c] sm:$0xf0]  ;;  %v3657_v41 = vld [vmem:[#allocation7 + $0x720] sm:$0xf]  ;;  %v3115_v19 = vld [vmem:[#allocation7 + $0x2f0] sm:$0xf0] }
  0x64   :  { %1974 = vmatpush.bf16.msrb.mxu0 %v3290_v12  ;;  %1987 = vmatpush.bf16.msrb.mxu1 %v3418_v13  ;;  %v3386_v38 = vor.u32 %v4073_v37, %v3385_v35  ;;  %v4109_v40 = vld [vmem:[#allocation7 + $0x62c] sm:$0xf0]  ;;  %v3513_v45 = vld [vmem:[#allocation7 + $0x600] sm:$0xf]  ;;  %v4035_v20 = vld [vmem:[#allocation7 + $0x3e4] sm:$0xf]  ;;  %v3118_v31 = vor.u32 %v4003_v15, %v3115_v19 }
  0x65   :  { %v3530_v42 = vor.u32 %v4109_v40, %v3529_v39  ;;  %v4141_v43 = vld [vmem:[#allocation7 + $0x72c] sm:$0xf0]  ;;  %v3641_v48 = vld [vmem:[#allocation7 + $0x700] sm:$0xf]  ;;  %v3243_v21 = vld [vmem:[#allocation7 + $0x3f0] sm:$0xf0] }
  0x66   :  { %2000 = vmatpush.bf16.msrb.mxu2 %v3546_v30  ;;  %2013 = vmatpush.bf16.msrb.mxu3 %v3674_v32  ;;  %v3658_v44 = vor.u32 %v4141_v43, %v3657_v41  ;;  %v4105_v46 = vld [vmem:[#allocation7 + $0x60c] sm:$0xf0]  ;;  %v3931_v24 = vld [vmem:[#allocation7 + $0xa4] sm:$0xf]  ;;  %v2955_v29 = vld [vmem:[#allocation7 + $0x1b0] sm:$0xf0] }
  0x67   :  { %v3514_v47 = vor.u32 %v4105_v46, %v3513_v45  ;;  %v4137_v49 = vld [vmem:[#allocation7 + $0x70c] sm:$0xf0]  ;;  %v3963_v28 = vld [vmem:[#allocation7 + $0x1a4] sm:$0xf]  ;;  %v139_v32 = vperm.slane %v4452_v51, 4  ;;  %v140_v33 = vperm.slane %v4452_v51, 5 }
  0x68   :  { %1975 = vmatpush.bf16.msrb.mxu0 %v3274_v23  ;;  %1988 = vmatpush.bf16.msrb.mxu1 %v3402_v25  ;;  %v3642_v50 = vor.u32 %v4137_v49, %v3641_v48  ;;  %v2974_v23 = vor.u32 %v3967_v10, %v2971_v11  ;;  %v2827_v25 = vld [vmem:[#allocation7 + $0xb0] sm:$0xf0]  ;;  %v4031_v40 = vld [vmem:[#allocation7 + $0x3c4] sm:$0xf] }
  0x69   :  { %v2830_v37 = vor.u32 %v3931_v24, %v2827_v25  ;;  %v3099_v39 = vld [vmem:[#allocation7 + $0x2d0] sm:$0xf0]  ;;  %v4027_v58 = vld [vmem:[#allocation7 + $0x3a4] sm:$0xf] }
  0x6a   :  { %2001 = vmatpush.bf16.msrb.mxu2 %v3530_v42  ;;  %2014 = vmatpush.bf16.msrb.mxu3 %v3658_v44  ;;  %v2958_v42 = vor.u32 %v3963_v28, %v2955_v29  ;;  %v3227_v43 = vld [vmem:[#allocation7 + $0x3d0] sm:$0xf0]  ;;  %v3927_v44 = vld [vmem:[#allocation7 + $0x84] sm:$0xf] }
  0x6b   :  { %v2811_v45 = vld [vmem:[#allocation7 + $0x90] sm:$0xf0]  ;;  %v3991_v11 = vld [vmem:[#allocation7 + $0x284] sm:$0xf] }
  0x6c   :  { %1976 = vmatpush.bf16.msrb.mxu0 %v3258_v36  ;;  %1989 = vmatpush.bf16.msrb.mxu1 %v3386_v38  ;;  %v3246_v36 = vor.u32 %v4035_v20, %v3243_v21  ;;  %v3999_v38 = vld [vmem:[#allocation7 + $0x2c4] sm:$0xf]  ;;  %v2939_v48 = vld [vmem:[#allocation7 + $0x190] sm:$0xf0] }
  0x6d   :  { %v3083_v57 = vld [vmem:[#allocation7 + $0x2b0] sm:$0xf0]  ;;  %v3919_v19 = vld [vmem:[#allocation7 + $0x44] sm:$0xf] }
  0x6e   :  { %2002 = vmatpush.bf16.msrb.mxu2 %v3514_v47  ;;  %2015 = vmatpush.bf16.msrb.mxu3 %v3642_v50  ;;  %v3959_v47 = vld [vmem:[#allocation7 + $0x184] sm:$0xf]  ;;  %v3211_v61 = vld [vmem:[#allocation7 + $0x3b0] sm:$0xf0] }
  0x6f   :  { %v2942_v60 = vor.u32 %v3959_v47, %v2939_v48  ;;  %v3214_v10 = vor.u32 %v4027_v58, %v3211_v61  ;;  %v2907_v24 = vld [vmem:[#allocation7 + $0x150] sm:$0xf0]  ;;  %v3987_v28 = vld [vmem:[#allocation7 + $0x264] sm:$0xf] }
  0x70   :  { %v3911_v58 = vld [vmem:[#allocation7 + $0x4] sm:$0xf] }
  0x71   :  { %v3943_v61 = vld [vmem:[#allocation7 + $0x104] sm:$0xf] }
  0xa4   :  { %v244_v54 = vpop.f32.mrf.mxu0  ;;  %v257_v26 = vpop.f32.mrf.mxu1 }
  0xa5   :  { %v245_v55 = vadd.f32 %v244_v54, %v135_v52  ;;  %v258_v56 = vadd.f32 %v257_v26, %v136_v53  ;;  %v3102_v52 = vor.u32 %v3999_v38, %v3099_v39  ;;  %v2814_v26 = vor.u32 %v3927_v44, %v2811_v45  ;;  %v3947_v44 = vld [vmem:[#allocation7 + $0x124] sm:$0xf]  ;;  %v2891_v45 = vld [vmem:[#allocation7 + $0x130] sm:$0xf0] }
  0xa7   :  { %vm339_vm1 = vcmp.gt.f32.partialorder %v245_v55, 0.0  ;;  %v347_v59 = vmul.f32 0.25, %v245_v55  ;;  %vm340_vm2 = vcmp.gt.f32.partialorder %v258_v56, 0.0  ;;  %v348_v62 = vmul.f32 0.25, %v258_v56 }
  0xa9   :  { %v355_v0 = vsel %vm339_vm1, %v245_v55, %v347_v59  ;;  %v356_v4 = vsel %vm340_vm2, %v258_v56, %v348_v62  ;;  %v3230_v55 = vor.u32 %v4031_v40, %v3227_v43  ;;  %v3995_v56 = vld [vmem:[#allocation7 + $0x2a4] sm:$0xf] }
  0xaa   :  { %v4458_v3 = vpack.c.bf16 %v355_v0, %v355_v0  ;;  %v4460_v8 = vpack.c.bf16 %v356_v4, %v356_v4  ;;  %v3923_v62 = vld [vmem:[#allocation7 + $0x64] sm:$0xf]  ;;  %v3086_v6 = vor.u32 %v3995_v56, %v3083_v57  ;;  %v2894_v56 = vor.u32 %v3947_v44, %v2891_v45  ;;  %v3163_v57 = vld [vmem:[#allocation7 + $0x350] sm:$0xf0] }
  0xab   :  { %v3915_v40 = vld [vmem:[#allocation7 + $0x24] sm:$0xf]  ;;  %v3611_v45 = vld [vmem:[#allocation7 + $0x6d0] sm:$0xf0] }
  0xac   :  { %v270_v9 = vpop.f32.mrf.mxu2  ;;  %v283_v13 = vpop.f32.mrf.mxu3  ;;  %1925 = vmatmul.bf16.vlgmr.msra.gmra.mxu0 %v4458_v3  ;;  %1938 = vmatmul.bf16.vlgmr.msra.gmra.mxu1 %v4460_v8  ;;  %v4127_v44 = vld [vmem:[#allocation7 + $0x6c4] sm:$0xf] }
  0xad   :  { %v271_v12 = vadd.f32 %v270_v9, %v137_v63  ;;  %v246_v14 = vpop.f32.mrf.mxu0  ;;  %v284_v16 = vadd.f32 %v283_v13, %v138_v1  ;;  %v259_v17 = vpop.f32.mrf.mxu1  ;;  %2021 = vmatpush.bf16.msra.mxu0 %v2862_v2  ;;  %2034 = vmatpush.bf16.msra.mxu1 %v2990_v5  ;;  %v2795_v63 = vld [vmem:[#allocation7 + $0x70] sm:$0xf0]  ;;  %v3955_v1 = vld [vmem:[#allocation7 + $0x164] sm:$0xf]  ;;  %v141_v5 = vperm.slane %v4452_v51, 6  ;;  %v142_v9 = vperm.slane %v4452_v51, 7 }
  0xae   :  { %v2923_v2 = vld [vmem:[#allocation7 + $0x170] sm:$0xf0]  ;;  %v2798_v15 = vor.u32 %v3923_v62, %v2795_v63  ;;  %v4023_v17 = vld [vmem:[#allocation7 + $0x384] sm:$0xf] }
  0xaf   :  { %vm341_vm3 = vcmp.gt.f32.partialorder %v271_v12, 0.0  ;;  %v349_v22 = vmul.f32 0.25, %v271_v12  ;;  %vm342_vm4 = vcmp.gt.f32.partialorder %v284_v16, 0.0  ;;  %v350_v27 = vmul.f32 0.25, %v284_v16  ;;  %v2875_v62 = vld [vmem:[#allocation7 + $0x110] sm:$0xf0] }
  0xb0   :  { %v4067_v63 = vld [vmem:[#allocation7 + $0x4e4] sm:$0xf] }
  0xb1   :  { %v357_v30 = vsel %vm341_vm3, %v271_v12, %v349_v22  ;;  %v358_v35 = vsel %vm342_vm4, %v284_v16, %v350_v27  ;;  %2022 = vmatpush.bf16.msra.mxu0 %v2846_v18  ;;  %2035 = vmatpush.bf16.msra.mxu1 %v2974_v23  ;;  %v3067_v12 = vld [vmem:[#allocation7 + $0x290] sm:$0xf0]  ;;  %v2926_v16 = vor.u32 %v3955_v1, %v2923_v2  ;;  %v3951_v23 = vld [vmem:[#allocation7 + $0x144] sm:$0xf] }
  0xb2   :  { %v4466_v34 = vpack.c.bf16 %v357_v30, %v357_v30  ;;  %v4468_v41 = vpack.c.bf16 %v358_v35, %v358_v35  ;;  %v3195_v18 = vld [vmem:[#allocation7 + $0x390] sm:$0xf0]  ;;  %v3070_v27 = vor.u32 %v3991_v11, %v3067_v12  ;;  %v2910_v39 = vor.u32 %v3951_v23, %v2907_v24  ;;  %v4011_v12 = vld [vmem:[#allocation7 + $0x324] sm:$0xf] }
  0xb3   :  { %v2779_v22 = vld [vmem:[#allocation7 + $0x50] sm:$0xf0]  ;;  %v2878_v11 = vor.u32 %v3943_v61, %v2875_v62  ;;  %v3975_v24 = vld [vmem:[#allocation7 + $0x204] sm:$0xf] }
  0xb4   :  { %v272_v46 = vpop.f32.mrf.mxu2  ;;  %1951 = vmatmul.bf16.vlgmr.msra.gmra.mxu2 %v4466_v34  ;;  %v285_v49 = vpop.f32.mrf.mxu3  ;;  %1964 = vmatmul.bf16.vlgmr.msra.gmra.mxu3 %v4468_v41  ;;  %v3179_v35 = vld [vmem:[#allocation7 + $0x370] sm:$0xf0]  ;;  %v2782_v38 = vor.u32 %v3919_v19, %v2779_v22  ;;  %v4155_v62 = vld [vmem:[#allocation7 + $0x7a4] sm:$0xf] }
  0xb5   :  { %2047 = vmatpush.bf16.msra.mxu2 %v3118_v31  ;;  %v296_v50 = vpop.f32.mrf.mxu0  ;;  %2060 = vmatpush.bf16.msra.mxu3 %v3246_v36  ;;  %v309_v54 = vpop.f32.mrf.mxu1  ;;  %v3198_v31 = vor.u32 %v4023_v17, %v3195_v18  ;;  %v3371_v2 = vld [vmem:[#allocation7 + $0x4f0] sm:$0xf0]  ;;  %v4063_v17 = vld [vmem:[#allocation7 + $0x4c4] sm:$0xf] }
  0xb6   :  { %v297_v53 = vadd.f32 %v296_v50, %v139_v32  ;;  %2023 = vmatpush.bf16.msra.mxu0 %v2830_v37  ;;  %v310_v59 = vadd.f32 %v309_v54, %v140_v33  ;;  %2036 = vmatpush.bf16.msra.mxu1 %v2958_v42  ;;  %v3051_v32 = vld [vmem:[#allocation7 + $0x270] sm:$0xf0]  ;;  %v4019_v33 = vld [vmem:[#allocation7 + $0x364] sm:$0xf] }
  0xb7   :  { %v2763_v42 = vld [vmem:[#allocation7 + $0x30] sm:$0xf0]  ;;  %v3054_v47 = vor.u32 %v3987_v28, %v3051_v32  ;;  %v3182_v50 = vor.u32 %v4019_v33, %v3179_v35  ;;  %v4015_v54 = vld [vmem:[#allocation7 + $0x344] sm:$0xf] }
  0xb8   :  { %vm343_vm5 = vcmp.gt.f32.partialorder %v297_v53, 0.0  ;;  %v351_v0 = vmul.f32 0.25, %v297_v53  ;;  %vm344_vm6 = vcmp.gt.f32.partialorder %v310_v59, 0.0  ;;  %v352_v4 = vmul.f32 0.25, %v310_v59  ;;  %v3355_v19 = vld [vmem:[#allocation7 + $0x4d0] sm:$0xf0] }
  0xb9   :  { %2048 = vmatpush.bf16.msra.mxu2 %v3102_v52  ;;  %2061 = vmatpush.bf16.msra.mxu3 %v3230_v55  ;;  %v3983_v52 = vld [vmem:[#allocation7 + $0x244] sm:$0xf]  ;;  %v3483_v22 = vld [vmem:[#allocation7 + $0x5d0] sm:$0xf0] }
  0xba   :  { %v359_v7 = vsel %vm343_vm5, %v297_v53, %v351_v0  ;;  %2024 = vmatpush.bf16.msra.mxu0 %v2814_v26  ;;  %v360_v14 = vsel %vm344_vm6, %v310_v59, %v352_v4  ;;  %2037 = vmatpush.bf16.msra.mxu1 %v2942_v60  ;;  %v3035_v53 = vld [vmem:[#allocation7 + $0x250] sm:$0xf0]  ;;  %v2766_v26 = vor.u32 %v3915_v40, %v2763_v42  ;;  %v4099_v4 = vld [vmem:[#allocation7 + $0x5e4] sm:$0xf] }
  0xbb   :  { %v4474_v13 = vpack.c.bf16 %v359_v7, %v359_v7  ;;  %v4476_v20 = vpack.c.bf16 %v360_v14, %v360_v14  ;;  %v2747_v59 = vld [vmem:[#allocation7 + $0x10] sm:$0xf0]  ;;  %v3038_v0 = vor.u32 %v3983_v52, %v3035_v53  ;;  %v3979_v7 = vld [vmem:[#allocation7 + $0x224] sm:$0xf] }
  0xbc   :  { %v322_v21 = vpop.f32.mrf.mxu2  ;;  %v335_v51 = vpop.f32.mrf.mxu3  ;;  %v3147_v14 = vld [vmem:[#allocation7 + $0x330] sm:$0xf0]  ;;  %v4131_v28 = vld [vmem:[#allocation7 + $0x6e4] sm:$0xf] }
  0xbd   :  { %v323_v25 = vadd.f32 %v322_v21, %v141_v5  ;;  %2049 = vmatpush.bf16.msra.mxu2 %v3086_v6  ;;  %1977 = vmatmul.bf16.vlgmr.msrb.gmra.mxu0 %v4474_v13  ;;  %v298_v29 = vpop.f32.mrf.mxu0  ;;  %v336_v30 = vadd.f32 %v335_v51, %v142_v9  ;;  %v311_v36 = vpop.f32.mrf.mxu1  ;;  %v3499_v5 = vld [vmem:[#allocation7 + $0x5f0] sm:$0xf0]  ;;  %v3166_v6 = vor.u32 %v4015_v54, %v3163_v57  ;;  %v4095_v21 = vld [vmem:[#allocation7 + $0x5c4] sm:$0xf] }
  0xbe   :  { %2062 = vmatpush.bf16.msra.mxu3 %v3214_v10  ;;  %1990 = vmatmul.bf16.vlgmr.msrb.gmra.mxu1 %v4476_v20  ;;  %v3019_v9 = vld [vmem:[#allocation7 + $0x230] sm:$0xf0]  ;;  %v2750_v10 = vor.u32 %v3911_v58, %v2747_v59  ;;  %v3150_v23 = vor.u32 %v4011_v12, %v3147_v14  ;;  %v4007_v51 = vld [vmem:[#allocation7 + $0x304] sm:$0xf] }
  0xbf   :  { %vm345_vm7 = vcmp.gt.f32.partialorder %v323_v25, 0.0  ;;  %v353_v37 = vmul.f32 0.25, %v323_v25  ;;  %2025 = vmatpush.bf16.msra.mxu0 %v2798_v15  ;;  %2038 = vmatpush.bf16.msra.mxu1 %v2926_v16  ;;  %vm346_vm8 = vcmp.gt.f32.partialorder %v336_v30, 0.0  ;;  %v354_v43 = vmul.f32 0.25, %v336_v30  ;;  %v3627_v29 = vld [vmem:[#allocation7 + $0x6f0] sm:$0xf0] }
  0xc0   :  { %v3374_v15 = vor.u32 %v4067_v63, %v3371_v2  ;;  %v3502_v16 = vor.u32 %v4099_v4, %v3499_v5  ;;  %v3022_v18 = vor.u32 %v3979_v7, %v3019_v9  ;;  %v4163_v32 = vld [vmem:[#allocation7 + $0x7e4] sm:$0xf]  ;;  %v3755_v33 = vld [vmem:[#allocation7 + $0x7f0] sm:$0xf0]  ;;  %v3630_v42 = vor.u32 %v4131_v28, %v3627_v29 }
  0xc1   :  { %v361_v46 = vsel %vm345_vm7, %v323_v25, %v353_v37  ;;  %2050 = vmatpush.bf16.msra.mxu2 %v3070_v27  ;;  %v362_v49 = vsel %vm346_vm8, %v336_v30, %v354_v43  ;;  %v3003_v25 = vld [vmem:[#allocation7 + $0x210] sm:$0xf0]  ;;  %v3358_v30 = vor.u32 %v4063_v17, %v3355_v19  ;;  %v4059_v35 = vld [vmem:[#allocation7 + $0x4a4] sm:$0xf]  ;;  %v3758_v43 = vor.u32 %v4163_v32, %v3755_v33 }
  0xc2   :  { %v4480_v48 = vpack.c.bf16 %v361_v46, %v361_v46  ;;  %2063 = vmatpush.bf16.msra.mxu3 %v3198_v31  ;;  %v4482_v55 = vpack.c.bf16 %v362_v49, %v362_v49  ;;  %v3131_v27 = vld [vmem:[#allocation7 + $0x310] sm:$0xf0]  ;;  %v3486_v31 = vor.u32 %v4095_v21, %v3483_v22  ;;  %v3006_v36 = vor.u32 %v3975_v24, %v3003_v25  ;;  %v4159_v49 = vld [vmem:[#allocation7 + $0x7c4] sm:$0xf] }
  0xc3   :  { %2026 = vmatpush.bf16.msra.mxu0 %v2782_v38  ;;  %2039 = vmatpush.bf16.msra.mxu1 %v2910_v39  ;;  %v3339_v37 = vld [vmem:[#allocation7 + $0x4b0] sm:$0xf0]  ;;  %v4091_v38 = vld [vmem:[#allocation7 + $0x5a4] sm:$0xf]  ;;  %v3134_v40 = vor.u32 %v4007_v51, %v3131_v27 }
  0xc4   :  { %2003 = vmatmul.bf16.vlgmr.msrb.gmra.mxu2 %v4480_v48  ;;  %v324_v60 = vpop.f32.mrf.mxu2  ;;  %2016 = vmatmul.bf16.vlgmr.msrb.gmra.mxu3 %v4482_v55  ;;  %v337_v1 = vpop.f32.mrf.mxu3  ;;  %v3467_v39 = vld [vmem:[#allocation7 + $0x5b0] sm:$0xf0]  ;;  %v3342_v46 = vor.u32 %v4059_v35, %v3339_v37  ;;  %v4055_v52 = vld [vmem:[#allocation7 + $0x484] sm:$0xf] }
  0xc5   :  { %2051 = vmatpush.bf16.msra.mxu2 %v3054_v47  ;;  %v3470_v47 = vor.u32 %v4091_v38, %v3467_v39  ;;  %v3323_v53 = vld [vmem:[#allocation7 + $0x490] sm:$0xf0]  ;;  %v4087_v54 = vld [vmem:[#allocation7 + $0x584] sm:$0xf] }
  0xc6   :  { %2064 = vmatpush.bf16.msra.mxu3 %v3182_v50  ;;  %v3739_v50 = vld [vmem:[#allocation7 + $0x7d0] sm:$0xf0]  ;;  %v4123_v58 = vld [vmem:[#allocation7 + $0x6a4] sm:$0xf]  ;;  %v3326_v60 = vor.u32 %v4055_v52, %v3323_v53  ;;  %v3974_v52 = vld [vmem:[#allocation7 + $0x1f4] sm:$0xf0] }
  0xc7   :  { %2027 = vmatpush.bf16.msra.mxu0 %v2766_v26  ;;  %2040 = vmatpush.bf16.msra.mxu1 %v2894_v56  ;;  %v3451_v26 = vld [vmem:[#allocation7 + $0x590] sm:$0xf0]  ;;  %v3614_v56 = vor.u32 %v4127_v44, %v3611_v45  ;;  %v3742_v57 = vor.u32 %v4159_v49, %v3739_v50  ;;  %v4083_v2 = vld [vmem:[#allocation7 + $0x564] sm:$0xf]  ;;  %v3942_v49 = vld [vmem:[#allocation7 + $0xf4] sm:$0xf0] }
  0xc8   :  { %v3595_v59 = vld [vmem:[#allocation7 + $0x6b0] sm:$0xf0]  ;;  %v3454_v61 = vor.u32 %v4087_v54, %v3451_v26  ;;  %v4119_v7 = vld [vmem:[#allocation7 + $0x684] sm:$0xf]  ;;  %v2993_v50 = vld [vmem:[#allocation7 + $0x1e8] sm:$0xf] }
  0xc9   :  { %2052 = vmatpush.bf16.msra.mxu2 %v3038_v0  ;;  %v3723_v63 = vld [vmem:[#allocation7 + $0x7b0] sm:$0xf0]  ;;  %v4051_v0 = vld [vmem:[#allocation7 + $0x464] sm:$0xf]  ;;  %v3598_v5 = vor.u32 %v4123_v58, %v3595_v59 }
  0xca   :  { %2065 = vmatpush.bf16.msra.mxu3 %v3166_v6  ;;  %v3307_v1 = vld [vmem:[#allocation7 + $0x470] sm:$0xf0]  ;;  %v3726_v6 = vor.u32 %v4155_v62, %v3723_v63  ;;  %v4151_v12 = vld [vmem:[#allocation7 + $0x784] sm:$0xf]  ;;  %v2849_v62 = vld [vmem:[#allocation7 + $0xc8] sm:$0xf] }
  0xcb   :  { %2028 = vmatpush.bf16.msra.mxu0 %v2750_v10  ;;  %2041 = vmatpush.bf16.msra.mxu1 %v2878_v11  ;;  %v3435_v4 = vld [vmem:[#allocation7 + $0x570] sm:$0xf0]  ;;  %v3310_v10 = vor.u32 %v4051_v0, %v3307_v1  ;;  %v4079_v17 = vld [vmem:[#allocation7 + $0x544] sm:$0xf]  ;;  %v3938_v0 = vld [vmem:[#allocation7 + $0xd4] sm:$0xf0] }
  0xcc   :  { %v3579_v9 = vld [vmem:[#allocation7 + $0x690] sm:$0xf0]  ;;  %v3438_v11 = vor.u32 %v4083_v2, %v3435_v4  ;;  %v4115_v22 = vld [vmem:[#allocation7 + $0x664] sm:$0xf]  ;;  %v2977_v1 = vld [vmem:[#allocation7 + $0x1c8] sm:$0xf] }
  0xcd   :  { %2053 = vmatpush.bf16.msra.mxu2 %v3022_v18  ;;  %v3707_v14 = vld [vmem:[#allocation7 + $0x790] sm:$0xf0]  ;;  %v3582_v19 = vor.u32 %v4119_v7, %v3579_v9  ;;  %v4147_v51 = vld [vmem:[#allocation7 + $0x764] sm:$0xf]  ;;  %v3970_v2 = vld [vmem:[#allocation7 + $0x1d4] sm:$0xf0] }
  0xce   :  { %2066 = vmatpush.bf16.msra.mxu3 %v3150_v23  ;;  %2029 = vmatmul.bf16.vlgmr.msra.gmra.mxu0 %v4458_v3  ;;  %v3419_v18 = vld [vmem:[#allocation7 + $0x550] sm:$0xf0]  ;;  %v3710_v21 = vor.u32 %v4151_v12, %v3707_v14  ;;  %v4043_v28 = vld [vmem:[#allocation7 + $0x424] sm:$0xf]  ;;  %v2850_v12 = vor.u32 %v3938_v0, %v2849_v62  ;;  %v2978_v14 = vor.u32 %v3970_v2, %v2977_v1  ;;  %v3954_v0 = vld [vmem:[#allocation7 + $0x154] sm:$0xf0] }
  0xcf   :  { %2073 = vmatpush.bf16.msrb.mxu0 %v3374_v15  ;;  %2086 = vmatpush.bf16.msrb.mxu1 %v3502_v16  ;;  %v4047_v15 = vld [vmem:[#allocation7 + $0x444] sm:$0xf]  ;;  %v3291_v16 = vld [vmem:[#allocation7 + $0x450] sm:$0xf0]  ;;  %v3422_v25 = vor.u32 %v4079_v17, %v3419_v18  ;;  %v2833_v18 = vld [vmem:[#allocation7 + $0xa8] sm:$0xf] }
  0xd0   :  { %2042 = vmatmul.bf16.vlgmr.msra.gmra.mxu1 %v4460_v8  ;;  %v3563_v23 = vld [vmem:[#allocation7 + $0x670] sm:$0xf0]  ;;  %v3294_v24 = vor.u32 %v4047_v15, %v3291_v16  ;;  %v4111_v35 = vld [vmem:[#allocation7 + $0x644] sm:$0xf]  ;;  %v3249_v15 = vld [vmem:[#allocation7 + $0x3e8] sm:$0xf] }
  0xd1   :  { %2054 = vmatpush.bf16.msra.mxu2 %v3006_v36  ;;  %v3691_v27 = vld [vmem:[#allocation7 + $0x770] sm:$0xf0]  ;;  %v3566_v32 = vor.u32 %v4115_v22, %v3563_v23  ;;  %v4143_v37 = vld [vmem:[#allocation7 + $0x744] sm:$0xf]  ;;  %v4038_v16 = vld [vmem:[#allocation7 + $0x3f4] sm:$0xf0] }
  0xd2   :  { %2067 = vmatpush.bf16.msra.mxu3 %v3134_v40  ;;  %v3275_v29 = vld [vmem:[#allocation7 + $0x430] sm:$0xf0]  ;;  %v3694_v33 = vor.u32 %v4147_v51, %v3691_v27  ;;  %v4071_v44 = vld [vmem:[#allocation7 + $0x504] sm:$0xf]  ;;  %v2961_v23 = vld [vmem:[#allocation7 + $0x1a8] sm:$0xf] }
  0xd3   :  { %2074 = vmatpush.bf16.msrb.mxu0 %v3358_v30  ;;  %2087 = vmatpush.bf16.msrb.mxu1 %v3486_v31  ;;  %v4075_v30 = vld [vmem:[#allocation7 + $0x524] sm:$0xf]  ;;  %v3403_v31 = vld [vmem:[#allocation7 + $0x530] sm:$0xf0]  ;;  %v3278_v38 = vor.u32 %v4043_v28, %v3275_v29  ;;  %v3105_v51 = vld [vmem:[#allocation7 + $0x2c8] sm:$0xf] }
  0xd4   :  { %2055 = vmatmul.bf16.vlgmr.msra.gmra.mxu2 %v4466_v34  ;;  %v3547_v36 = vld [vmem:[#allocation7 + $0x650] sm:$0xf0]  ;;  %v3406_v39 = vor.u32 %v4075_v30, %v3403_v31  ;;  %v4107_v54 = vld [vmem:[#allocation7 + $0x624] sm:$0xf]  ;;  %v4002_v27 = vld [vmem:[#allocation7 + $0x2d4] sm:$0xf0] }
  0xd5   :  { %2099 = vmatpush.bf16.msrb.mxu2 %v3630_v42  ;;  %2068 = vmatmul.bf16.vlgmr.msra.gmra.mxu3 %v4468_v41  ;;  %v3675_v40 = vld [vmem:[#allocation7 + $0x750] sm:$0xf0]  ;;  %v4039_v42 = vld [vmem:[#allocation7 + $0x404] sm:$0xf]  ;;  %v3233_v29 = vld [vmem:[#allocation7 + $0x3c8] sm:$0xf] }
  0xd6   :  { %2112 = vmatpush.bf16.msrb.mxu3 %v3758_v43  ;;  %v3259_v43 = vld [vmem:[#allocation7 + $0x410] sm:$0xf0]  ;;  %v3678_v53 = vor.u32 %v4143_v37, %v3675_v40  ;;  %v4139_v58 = vld [vmem:[#allocation7 + $0x724] sm:$0xf]  ;;  %v4034_v30 = vld [vmem:[#allocation7 + $0x3d4] sm:$0xf0] }
  0xd7   :  { %2075 = vmatpush.bf16.msrb.mxu0 %v3342_v46  ;;  %2088 = vmatpush.bf16.msrb.mxu1 %v3470_v47  ;;  %v3387_v45 = vld [vmem:[#allocation7 + $0x510] sm:$0xf0]  ;;  %v2865_v46 = vld [vmem:[#allocation7 + $0xe8] sm:$0xf]  ;;  %v3550_v47 = vor.u32 %v4111_v35, %v3547_v36  ;;  %v4135_v7 = vld [vmem:[#allocation7 + $0x704] sm:$0xf]  ;;  %v3106_v35 = vor.u32 %v4002_v27, %v3105_v51 }
  0xd8   :  { %v3531_v26 = vld [vmem:[#allocation7 + $0x630] sm:$0xf0]  ;;  %v2945_v36 = vld [vmem:[#allocation7 + $0x188] sm:$0xf]  ;;  %v3962_v37 = vld [vmem:[#allocation7 + $0x194] sm:$0xf0] }
  0xd9   :  { %2100 = vmatpush.bf16.msrb.mxu2 %v3614_v56  ;;  %v3262_v56 = vor.u32 %v4039_v42, %v3259_v43  ;;  %v3659_v59 = vld [vmem:[#allocation7 + $0x730] sm:$0xf0]  ;;  %v3534_v63 = vor.u32 %v4107_v54, %v3531_v26  ;;  %v3998_v40 = vld [vmem:[#allocation7 + $0x2b4] sm:$0xf0]  ;;  %v3217_v43 = vld [vmem:[#allocation7 + $0x3a8] sm:$0xf] }
  0xda   :  { %2113 = vmatpush.bf16.msrb.mxu3 %v3742_v57  ;;  %v3390_v57 = vor.u32 %v4071_v44, %v3387_v45  ;;  %v3662_v4 = vor.u32 %v4139_v58, %v3659_v59  ;;  %v3643_v9 = vld [vmem:[#allocation7 + $0x710] sm:$0xf0]  ;;  %v4030_v44 = vld [vmem:[#allocation7 + $0x3b4] sm:$0xf0]  ;;  %v2946_v45 = vor.u32 %v3962_v37, %v2945_v36  ;;  %v3073_v54 = vld [vmem:[#allocation7 + $0x288] sm:$0xf] }
  0xdb   :  { %2076 = vmatpush.bf16.msrb.mxu0 %v3326_v60  ;;  %2089 = vmatpush.bf16.msrb.mxu1 %v3454_v61  ;;  %v2866_v60 = vor.u32 %v3942_v49, %v2865_v46  ;;  %v2994_v61 = vor.u32 %v3974_v52, %v2993_v50  ;;  %v2801_v46 = vld [vmem:[#allocation7 + $0x68] sm:$0xf]  ;;  %v3958_v52 = vld [vmem:[#allocation7 + $0x174] sm:$0xf0] }
  0xdc   :  { %v2929_v50 = vld [vmem:[#allocation7 + $0x168] sm:$0xf]  ;;  %v3994_v26 = vld [vmem:[#allocation7 + $0x294] sm:$0xf0] }
  0xdd   :  { %2101 = vmatpush.bf16.msrb.mxu2 %v3598_v5  ;;  %v4103_v5 = vld [vmem:[#allocation7 + $0x604] sm:$0xf]  ;;  %v4026_v58 = vld [vmem:[#allocation7 + $0x394] sm:$0xf0]  ;;  %v2930_v59 = vor.u32 %v3958_v52, %v2929_v50  ;;  %v3074_v62 = vor.u32 %v3994_v26, %v3073_v54  ;;  %v3057_v2 = vld [vmem:[#allocation7 + $0x268] sm:$0xf] }
  0xde   :  { %2114 = vmatpush.bf16.msrb.mxu3 %v3726_v6  ;;  %v3515_v6 = vld [vmem:[#allocation7 + $0x610] sm:$0xf0]  ;;  %v2881_v51 = vld [vmem:[#allocation7 + $0x108] sm:$0xf]  ;;  %v3946_v27 = vld [vmem:[#allocation7 + $0x114] sm:$0xf0] }
  0xdf   :  { %2077 = vmatpush.bf16.msrb.mxu0 %v3310_v10  ;;  %2090 = vmatpush.bf16.msrb.mxu1 %v3438_v11  ;;  %v3121_v10 = vld [vmem:[#allocation7 + $0x2e8] sm:$0xf]  ;;  %v4006_v11 = vld [vmem:[#allocation7 + $0x2f4] sm:$0xf0]  ;;  %v3518_v17 = vor.u32 %v4103_v5, %v3515_v6 }
  0xe0   :  { %v3122_v22 = vor.u32 %v4006_v11, %v3121_v10  ;;  %v3185_v6 = vld [vmem:[#allocation7 + $0x368] sm:$0xf]  ;;  %v3918_v11 = vld [vmem:[#allocation7 + $0x34] sm:$0xf0] }
  0xe1   :  { %2102 = vmatpush.bf16.msrb.mxu2 %v3582_v19  ;;  %v3934_v19 = vld [vmem:[#allocation7 + $0xb4] sm:$0xf0]  ;;  %v2769_v10 = vld [vmem:[#allocation7 + $0x28] sm:$0xf] }
  0xe2   :  { %2115 = vmatpush.bf16.msrb.mxu3 %v3710_v21  ;;  %v3646_v21 = vor.u32 %v4135_v7, %v3643_v9  ;;  %v2834_v28 = vor.u32 %v3934_v19, %v2833_v18  ;;  %v4022_v7 = vld [vmem:[#allocation7 + $0x374] sm:$0xf0]  ;;  %v2770_v19 = vor.u32 %v3918_v11, %v2769_v10  ;;  %v3009_v52 = vld [vmem:[#allocation7 + $0x208] sm:$0xf] }
  0xe3   :  { %2078 = vmatpush.bf16.msrb.mxu0 %v3294_v24  ;;  %2091 = vmatpush.bf16.msrb.mxu1 %v3422_v25  ;;  %v3966_v24 = vld [vmem:[#allocation7 + $0x1b4] sm:$0xf0]  ;;  %v3250_v25 = vor.u32 %v4038_v16, %v3249_v15  ;;  %v3186_v16 = vor.u32 %v4022_v7, %v3185_v6  ;;  %v3137_v54 = vld [vmem:[#allocation7 + $0x308] sm:$0xf] }
  0xe4   :  { %v2962_v31 = vor.u32 %v3966_v24, %v2961_v23  ;;  %v3950_v15 = vld [vmem:[#allocation7 + $0x134] sm:$0xf0]  ;;  %v2753_v23 = vld [vmem:[#allocation7 + $0x8] sm:$0xf] }
  0xe5   :  { %2103 = vmatpush.bf16.msrb.mxu2 %v3566_v32  ;;  %v2817_v32 = vld [vmem:[#allocation7 + $0x88] sm:$0xf]  ;;  %v3986_v18 = vld [vmem:[#allocation7 + $0x254] sm:$0xf0] }
  0xe6   :  { %2116 = vmatpush.bf16.msrb.mxu3 %v3694_v33  ;;  %v3930_v33 = vld [vmem:[#allocation7 + $0x94] sm:$0xf0]  ;;  %v3617_v7 = vld [vmem:[#allocation7 + $0x6c8] sm:$0xf] }
  0xe7   :  { %2079 = vmatpush.bf16.msrb.mxu0 %v3278_v38  ;;  %2092 = vmatpush.bf16.msrb.mxu1 %v3406_v39  ;;  %v3234_v38 = vor.u32 %v4034_v30, %v3233_v29  ;;  %v3089_v39 = vld [vmem:[#allocation7 + $0x2a8] sm:$0xf]  ;;  %v2818_v42 = vor.u32 %v3930_v33, %v2817_v32  ;;  %v4070_v30 = vld [vmem:[#allocation7 + $0x4f4] sm:$0xf0] }
  0xe8   :  { %v3090_v49 = vor.u32 %v3998_v40, %v3089_v39  ;;  %v3377_v29 = vld [vmem:[#allocation7 + $0x4e8] sm:$0xf]  ;;  %v4102_v33 = vld [vmem:[#allocation7 + $0x5f4] sm:$0xf0]  ;;  %v2882_v40 = vor.u32 %v3946_v27, %v2881_v51 }
  0xe9   :  { %2104 = vmatpush.bf16.msrb.mxu2 %v3550_v47  ;;  %v3926_v47 = vld [vmem:[#allocation7 + $0x74] sm:$0xf0]  ;;  %v3745_v11 = vld [vmem:[#allocation7 + $0x7c8] sm:$0xf] }
  0xea   :  { %2117 = vmatpush.bf16.msrb.mxu3 %v3678_v53  ;;  %v3218_v53 = vor.u32 %v4030_v44, %v3217_v43  ;;  %v3982_v36 = vld [vmem:[#allocation7 + $0x234] sm:$0xf0]  ;;  %v3361_v43 = vld [vmem:[#allocation7 + $0x4c8] sm:$0xf] }
  0xeb   :  { %2080 = vmatpush.bf16.msrb.mxu0 %v3262_v56  ;;  %2093 = vmatpush.bf16.msrb.mxu1 %v3390_v57  ;;  %v2802_v56 = vor.u32 %v3926_v47, %v2801_v46  ;;  %v3201_v57 = vld [vmem:[#allocation7 + $0x388] sm:$0xf]  ;;  %v4014_v39 = vld [vmem:[#allocation7 + $0x334] sm:$0xf0] }
  0xec   :  { %v3202_v1 = vor.u32 %v4026_v58, %v3201_v57  ;;  %v4066_v46 = vld [vmem:[#allocation7 + $0x4d4] sm:$0xf0]  ;;  %v3489_v47 = vld [vmem:[#allocation7 + $0x5c8] sm:$0xf] }
  0xed   :  { %2105 = vmatpush.bf16.msrb.mxu2 %v3534_v63  ;;  %v2913_v63 = vld [vmem:[#allocation7 + $0x148] sm:$0xf]  ;;  %v4010_v26 = vld [vmem:[#allocation7 + $0x314] sm:$0xf0]  ;;  %v3362_v58 = vor.u32 %v4066_v46, %v3361_v43 }
  0xee   :  { %2118 = vmatpush.bf16.msrb.mxu3 %v3662_v4  ;;  %2081 = vmatmul.bf16.vlgmr.msrb.gmra.mxu0 %v4474_v13  ;;  %v3990_v4 = vld [vmem:[#allocation7 + $0x274] sm:$0xf0]  ;;  %v2914_v9 = vor.u32 %v3954_v0, %v2913_v63  ;;  %v3345_v63 = vld [vmem:[#allocation7 + $0x4a8] sm:$0xf] }
  0xef   :  { %2125 = vmatpush.bf16.msra.mxu0 %v2866_v60  ;;  %2138 = vmatpush.bf16.msra.mxu1 %v2994_v61  ;;  %v2785_v60 = vld [vmem:[#allocation7 + $0x48] sm:$0xf]  ;;  %v3922_v61 = vld [vmem:[#allocation7 + $0x54] sm:$0xf0] }
  0xf0   :  { %2094 = vmatmul.bf16.vlgmr.msrb.gmra.mxu1 %v4476_v20  ;;  %v2786_v5 = vor.u32 %v3922_v61, %v2785_v60  ;;  %v4134_v57 = vld [vmem:[#allocation7 + $0x6f4] sm:$0xf0] }
  0xf1   :  { %2106 = vmatpush.bf16.msrb.mxu2 %v3518_v17  ;;  %v3041_v17 = vld [vmem:[#allocation7 + $0x248] sm:$0xf]  ;;  %v4166_v60 = vld [vmem:[#allocation7 + $0x7f4] sm:$0xf0] }
  0xf2   :  { %2119 = vmatpush.bf16.msrb.mxu3 %v3646_v21  ;;  %v3169_v21 = vld [vmem:[#allocation7 + $0x348] sm:$0xf]  ;;  %v4062_v0 = vld [vmem:[#allocation7 + $0x4b4] sm:$0xf0] }
  0xf3   :  { %2126 = vmatpush.bf16.msra.mxu0 %v2850_v12  ;;  %2139 = vmatpush.bf16.msra.mxu1 %v2978_v14  ;;  %v3058_v12 = vor.u32 %v3990_v4, %v3057_v2  ;;  %v2897_v14 = vld [vmem:[#allocation7 + $0x128] sm:$0xf]  ;;  %v3346_v10 = vor.u32 %v4062_v0, %v3345_v63  ;;  %v4158_v51 = vld [vmem:[#allocation7 + $0x7b4] sm:$0xf0] }
  0xf4   :  { %2107 = vmatmul.bf16.vlgmr.msrb.gmra.mxu2 %v4480_v48  ;;  %v2898_v24 = vor.u32 %v3950_v15, %v2897_v14  ;;  %v3473_v4 = vld [vmem:[#allocation7 + $0x5a8] sm:$0xf]  ;;  %v4050_v43 = vld [vmem:[#allocation7 + $0x454] sm:$0xf0] }
  0xf5   :  { %2151 = vmatpush.bf16.msra.mxu2 %v3122_v22  ;;  %2120 = vmatmul.bf16.vlgmr.msrb.gmra.mxu3 %v4482_v55  ;;  %v4018_v22 = vld [vmem:[#allocation7 + $0x354] sm:$0xf0]  ;;  %v3329_v15 = vld [vmem:[#allocation7 + $0x488] sm:$0xf] }
  0xf6   :  { %2164 = vmatpush.bf16.msra.mxu3 %v3250_v25  ;;  %v3914_v25 = vld [vmem:[#allocation7 + $0x14] sm:$0xf0]  ;;  %v3170_v32 = vor.u32 %v4018_v22, %v3169_v21  ;;  %v3601_v22 = vld [vmem:[#allocation7 + $0x6a8] sm:$0xf] }
  0xf7   :  { %2127 = vmatpush.bf16.msra.mxu0 %v2834_v28  ;;  %2140 = vmatpush.bf16.msra.mxu1 %v2962_v31  ;;  %v3042_v28 = vor.u32 %v3986_v18, %v3041_v17  ;;  %v3505_v31 = vld [vmem:[#allocation7 + $0x5e8] sm:$0xf]  ;;  %v2754_v37 = vor.u32 %v3914_v25, %v2753_v23  ;;  %v4126_v23 = vld [vmem:[#allocation7 + $0x6b4] sm:$0xf0] }
  0xf8   :  { %v3506_v44 = vor.u32 %v4102_v33, %v3505_v31  ;;  %v3457_v18 = vld [vmem:[#allocation7 + $0x588] sm:$0xf]  ;;  %v4082_v46 = vld [vmem:[#allocation7 + $0x554] sm:$0xf0] }
  0xf9   :  { %2152 = vmatpush.bf16.msra.mxu2 %v3106_v35  ;;  %v3025_v35 = vld [vmem:[#allocation7 + $0x228] sm:$0xf]  ;;  %v4114_v63 = vld [vmem:[#allocation7 + $0x654] sm:$0xf0] }
  0xfa   :  { %2165 = vmatpush.bf16.msra.mxu3 %v3234_v38  ;;  %v3153_v38 = vld [vmem:[#allocation7 + $0x328] sm:$0xf] }
  0xfb   :  { %2128 = vmatpush.bf16.msra.mxu0 %v2818_v42  ;;  %2141 = vmatpush.bf16.msra.mxu1 %v2946_v45  ;;  %v3378_v42 = vor.u32 %v4070_v30, %v3377_v29  ;;  %v3026_v45 = vor.u32 %v3982_v36, %v3025_v35  ;;  %v3154_v50 = vor.u32 %v4014_v39, %v3153_v38  ;;  %v3729_v25 = vld [vmem:[#allocation7 + $0x7a8] sm:$0xf]  ;;  %v4054_v29 = vld [vmem:[#allocation7 + $0x474] sm:$0xf0] }
  0xfc   :  { %v3602_v30 = vor.u32 %v4126_v23, %v3601_v22  ;;  %v3441_v31 = vld [vmem:[#allocation7 + $0x568] sm:$0xf]  ;;  %v3730_v33 = vor.u32 %v4158_v51, %v3729_v25  ;;  %v4122_v36 = vld [vmem:[#allocation7 + $0x694] sm:$0xf0]  ;;  %v3936_v25 = vld [vmem:[#allocation7 + $0xcc] sm:$0xf] }
  0xfd   :  { %2153 = vmatpush.bf16.msra.mxu2 %v3090_v49  ;;  %v4098_v49 = vld [vmem:[#allocation7 + $0x5d4] sm:$0xf0]  ;;  %v3585_v35 = vld [vmem:[#allocation7 + $0x688] sm:$0xf] }
  0xfe   :  { %2166 = vmatpush.bf16.msra.mxu3 %v3218_v53  ;;  %v3978_v53 = vld [vmem:[#allocation7 + $0x214] sm:$0xf0]  ;;  %v3490_v61 = vor.u32 %v4098_v49, %v3489_v47  ;;  %v3713_v38 = vld [vmem:[#allocation7 + $0x788] sm:$0xf] }
  0xff   :  { %2129 = vmatpush.bf16.msra.mxu0 %v2802_v56  ;;  %2142 = vmatpush.bf16.msra.mxu1 %v2930_v59  ;;  %v3633_v56 = vld [vmem:[#allocation7 + $0x6e8] sm:$0xf]  ;;  %v4154_v39 = vld [vmem:[#allocation7 + $0x794] sm:$0xf0] }
 0x100   :  { %v3761_v59 = vld [vmem:[#allocation7 + $0x7e8] sm:$0xf]  ;;  %v3634_v2 = vor.u32 %v4134_v57, %v3633_v56  ;;  %v3714_v47 = vor.u32 %v4154_v39, %v3713_v38  ;;  %v4046_v57 = vld [vmem:[#allocation7 + $0x434] sm:$0xf0]  ;;  %v3123_v38 = vld [vmem:[#allocation7 + $0x2f8] sm:$0xf0] }
 0x101   :  { %2154 = vmatpush.bf16.msra.mxu2 %v3074_v62  ;;  %v3010_v62 = vor.u32 %v3978_v53, %v3009_v52  ;;  %v3762_v6 = vor.u32 %v4166_v60, %v3761_v59  ;;  %v3569_v49 = vld [vmem:[#allocation7 + $0x668] sm:$0xf]  ;;  %v4078_v60 = vld [vmem:[#allocation7 + $0x534] sm:$0xf0] }
 0x102   :  { %2167 = vmatpush.bf16.msra.mxu3 %v3202_v1  ;;  %v3138_v1 = vor.u32 %v4010_v26, %v3137_v54  ;;  %v3697_v53 = vld [vmem:[#allocation7 + $0x768] sm:$0xf]  ;;  %v4150_v54 = vld [vmem:[#allocation7 + $0x774] sm:$0xf0] }
 0x103   :  { %2130 = vmatpush.bf16.msra.mxu0 %v2786_v5  ;;  %2143 = vmatpush.bf16.msra.mxu1 %v2914_v9  ;;  %v4094_v5 = vld [vmem:[#allocation7 + $0x5b4] sm:$0xf0]  ;;  %v3281_v56 = vld [vmem:[#allocation7 + $0x428] sm:$0xf] }
 0x104   :  { %v4130_v9 = vld [vmem:[#allocation7 + $0x6d4] sm:$0xf0]  ;;  %v3474_v14 = vor.u32 %v4094_v5, %v3473_v4  ;;  %v3409_v59 = vld [vmem:[#allocation7 + $0x528] sm:$0xf]  ;;  %v3282_v0 = vor.u32 %v4046_v57, %v3281_v56  ;;  %v4032_v57 = vld [vmem:[#allocation7 + $0x3cc] sm:$0xf] }
 0x105   :  { %2155 = vmatpush.bf16.msra.mxu2 %v3058_v12  ;;  %v4162_v12 = vld [vmem:[#allocation7 + $0x7d4] sm:$0xf0]  ;;  %v3618_v17 = vor.u32 %v4130_v9, %v3617_v7  ;;  %v3265_v4 = vld [vmem:[#allocation7 + $0x408] sm:$0xf]  ;;  %v3410_v5 = vor.u32 %v4078_v60, %v3409_v59  ;;  %v3928_v60 = vld [vmem:[#allocation7 + $0x8c] sm:$0xf] }
 0x106   :  { %2168 = vmatpush.bf16.msra.mxu3 %v3186_v16  ;;  %v4058_v16 = vld [vmem:[#allocation7 + $0x494] sm:$0xf0]  ;;  %v3746_v21 = vor.u32 %v4162_v12, %v3745_v11  ;;  %v3393_v7 = vld [vmem:[#allocation7 + $0x508] sm:$0xf]  ;;  %v3940_v11 = vld [vmem:[#allocation7 + $0xec] sm:$0xf] }
 0x107   :  { %2131 = vmatpush.bf16.msra.mxu0 %v2770_v19  ;;  %2144 = vmatpush.bf16.msra.mxu1 %v2898_v24  ;;  %v4090_v19 = vld [vmem:[#allocation7 + $0x594] sm:$0xf0]  ;;  %v3330_v24 = vor.u32 %v4058_v16, %v3329_v15  ;;  %v2867_v12 = vld [vmem:[#allocation7 + $0xf8] sm:$0xf0] }
 0x108   :  { %v3458_v27 = vor.u32 %v4090_v19, %v3457_v18  ;;  %v4074_v9 = vld [vmem:[#allocation7 + $0x514] sm:$0xf0]  ;;  %v2995_v16 = vld [vmem:[#allocation7 + $0x1f8] sm:$0xf0] }
 0x109   :  { %2156 = vmatpush.bf16.msra.mxu2 %v3042_v28  ;;  %v3313_v28 = vld [vmem:[#allocation7 + $0x468] sm:$0xf]  ;;  %v4110_v18 = vld [vmem:[#allocation7 + $0x634] sm:$0xf0]  ;;  %v3394_v23 = vor.u32 %v4074_v9, %v3393_v7  ;;  %v4028_v9 = vld [vmem:[#allocation7 + $0x3ac] sm:$0xf] }
 0x10a   :  { %2169 = vmatpush.bf16.msra.mxu3 %v3170_v32  ;;  %v4086_v32 = vld [vmem:[#allocation7 + $0x574] sm:$0xf0] }
 0x10b   :  { %2132 = vmatpush.bf16.msra.mxu0 %v2754_v37  ;;  %2145 = vmatpush.bf16.msra.mxu1 %v2882_v40  ;;  %v3314_v37 = vor.u32 %v4054_v29, %v3313_v28  ;;  %v3442_v40 = vor.u32 %v4086_v32, %v3441_v31  ;;  %v4142_v22 = vld [vmem:[#allocation7 + $0x734] sm:$0xf0]  ;;  %v2851_v28 = vld [vmem:[#allocation7 + $0xd8] sm:$0xf0]  ;;  %v3968_v29 = vld [vmem:[#allocation7 + $0x1cc] sm:$0xf] }
 0x10c   :  { %v3521_v32 = vld [vmem:[#allocation7 + $0x608] sm:$0xf]  ;;  %v2854_v39 = vor.u32 %v3936_v25, %v2851_v28 }
 0x10d   :  { %2157 = vmatpush.bf16.msra.mxu2 %v3026_v45  ;;  %v3425_v45 = vld [vmem:[#allocation7 + $0x548] sm:$0xf] }
 0x10e   :  { %2170 = vmatpush.bf16.msra.mxu3 %v3154_v50  ;;  %2133 = vmatmul.bf16.vlgmr.msra.gmra.mxu0 %v4458_v3  ;;  %v4118_v50 = vld [vmem:[#allocation7 + $0x674] sm:$0xf0]  ;;  %v3426_v26 = vor.u32 %v4082_v46, %v3425_v45  ;;  %v3932_v45 = vld [vmem:[#allocation7 + $0xac] sm:$0xf]  ;;  %v2835_v46 = vld [vmem:[#allocation7 + $0xb8] sm:$0xf0] }
 0x10f   :  { %2177 = vmatpush.bf16.msrb.mxu0 %v3378_v42  ;;  %2190 = vmatpush.bf16.msrb.mxu1 %v3506_v44  ;;  %v3297_v42 = vld [vmem:[#allocation7 + $0x448] sm:$0xf]  ;;  %v3586_v44 = vor.u32 %v4122_v36, %v3585_v35  ;;  %v4138_v36 = vld [vmem:[#allocation7 + $0x714] sm:$0xf0]  ;;  %v2838_v56 = vor.u32 %v3932_v45, %v2835_v46  ;;  %v3948_v45 = vld [vmem:[#allocation7 + $0x12c] sm:$0xf] }
 0x110   :  { %2146 = vmatmul.bf16.vlgmr.msra.gmra.mxu1 %v4460_v8  ;;  %v3298_v52 = vor.u32 %v4050_v43, %v3297_v42  ;;  %v3649_v35 = vld [vmem:[#allocation7 + $0x708] sm:$0xf]  ;;  %v3251_v42 = vld [vmem:[#allocation7 + $0x3f8] sm:$0xf0] }
 0x111   :  { %2158 = vmatpush.bf16.msra.mxu2 %v3010_v62  ;;  %v3553_v62 = vld [vmem:[#allocation7 + $0x648] sm:$0xf]  ;;  %v2899_v46 = vld [vmem:[#allocation7 + $0x138] sm:$0xf0] }
 0x112   :  { %2171 = vmatpush.bf16.msra.mxu3 %v3138_v1  ;;  %v3681_v1 = vld [vmem:[#allocation7 + $0x748] sm:$0xf] }
 0x113   :  { %2178 = vmatpush.bf16.msrb.mxu0 %v3362_v58  ;;  %2191 = vmatpush.bf16.msrb.mxu1 %v3490_v61  ;;  %v3570_v58 = vor.u32 %v4118_v50, %v3569_v49  ;;  %v3698_v61 = vor.u32 %v4150_v54, %v3697_v53  ;;  %v3964_v50 = vld [vmem:[#allocation7 + $0x1ac] sm:$0xf] }
 0x114   :  { %2159 = vmatmul.bf16.vlgmr.msra.gmra.mxu2 %v4466_v34  ;;  %v4000_v54 = vld [vmem:[#allocation7 + $0x2cc] sm:$0xf] }
 0x115   :  { %2203 = vmatpush.bf16.msrb.mxu2 %v3634_v2  ;;  %2172 = vmatmul.bf16.vlgmr.msra.gmra.mxu3 %v4468_v41  ;;  %v4146_v2 = vld [vmem:[#allocation7 + $0x754] sm:$0xf0] }
 0x116   :  { %2216 = vmatpush.bf16.msrb.mxu3 %v3762_v6  ;;  %v4042_v6 = vld [vmem:[#allocation7 + $0x414] sm:$0xf0]  ;;  %v3682_v15 = vor.u32 %v4146_v2, %v3681_v1 }
 0x117   :  { %2179 = vmatpush.bf16.msrb.mxu0 %v3346_v10  ;;  %2192 = vmatpush.bf16.msrb.mxu1 %v3474_v14  ;;  %v3554_v10 = vor.u32 %v4114_v63, %v3553_v62  ;;  %v3972_v14 = vld [vmem:[#allocation7 + $0x1ec] sm:$0xf]  ;;  %v3266_v19 = vor.u32 %v4042_v6, %v3265_v4 }
 0x118   :  { %v2998_v51 = vor.u32 %v3972_v14, %v2995_v16  ;;  %v3960_v63 = vld [vmem:[#allocation7 + $0x18c] sm:$0xf]  ;;  %v2803_v14 = vld [vmem:[#allocation7 + $0x78] sm:$0xf0] }
 0x119   :  { %2204 = vmatpush.bf16.msrb.mxu2 %v3618_v17  ;;  %v3537_v17 = vld [vmem:[#allocation7 + $0x628] sm:$0xf]  ;;  %v3996_v4 = vld [vmem:[#allocation7 + $0x2ac] sm:$0xf] }
 0x11a   :  { %2217 = vmatpush.bf16.msrb.mxu3 %v3746_v21  ;;  %v3665_v21 = vld [vmem:[#allocation7 + $0x728] sm:$0xf]  ;;  %v3956_v16 = vld [vmem:[#allocation7 + $0x16c] sm:$0xf] }
 0x11b   :  { %2180 = vmatpush.bf16.msrb.mxu0 %v3330_v24  ;;  %2193 = vmatpush.bf16.msrb.mxu1 %v3458_v27  ;;  %v2870_v24 = vor.u32 %v3940_v11, %v2867_v12  ;;  %v3538_v27 = vor.u32 %v4110_v18, %v3537_v17  ;;  %v3666_v31 = vor.u32 %v4142_v22, %v3665_v21  ;;  %v3924_v12 = vld [vmem:[#allocation7 + $0x6c] sm:$0xf]  ;;  %v2931_v17 = vld [vmem:[#allocation7 + $0x178] sm:$0xf0] }
 0x11c   :  { %v3075_v21 = vld [vmem:[#allocation7 + $0x298] sm:$0xf0]  ;;  %v2806_v22 = vor.u32 %v3924_v12, %v2803_v14  ;;  %v2934_v25 = vor.u32 %v3956_v16, %v2931_v17  ;;  %v4012_v14 = vld [vmem:[#allocation7 + $0x32c] sm:$0xf] }
 0x11d   :  { %2205 = vmatpush.bf16.msrb.mxu2 %v3602_v30  ;;  %v2979_v30 = vld [vmem:[#allocation7 + $0x1d8] sm:$0xf0] }
 0x11e   :  { %2218 = vmatpush.bf16.msrb.mxu3 %v3730_v33  ;;  %v4106_v33 = vld [vmem:[#allocation7 + $0x614] sm:$0xf0]  ;;  %v2982_v43 = vor.u32 %v3968_v29, %v2979_v30  ;;  %v3952_v29 = vld [vmem:[#allocation7 + $0x14c] sm:$0xf]  ;;  %v2915_v30 = vld [vmem:[#allocation7 + $0x158] sm:$0xf0] }
 0x11f   :  { %2181 = vmatpush.bf16.msrb.mxu0 %v3314_v37  ;;  %2194 = vmatpush.bf16.msrb.mxu1 %v3442_v40  ;;  %v4004_v37 = vld [vmem:[#allocation7 + $0x2ec] sm:$0xf] }
 0x120   :  { %v4036_v40 = vld [vmem:[#allocation7 + $0x3ec] sm:$0xf]  ;;  %v3126_v49 = vor.u32 %v4004_v37, %v3123_v38 }
 0x121   :  { %2206 = vmatpush.bf16.msrb.mxu2 %v3586_v44  ;;  %v3522_v44 = vor.u32 %v4106_v33, %v3521_v32  ;;  %v3254_v53 = vor.u32 %v4036_v40, %v3251_v42  ;;  %v3988_v33 = vld [vmem:[#allocation7 + $0x26c] sm:$0xf]  ;;  %v2918_v40 = vor.u32 %v3952_v29, %v2915_v30  ;;  %v3139_v30 = vld [vmem:[#allocation7 + $0x318] sm:$0xf0] }
 0x122   :  { %2219 = vmatpush.bf16.msrb.mxu3 %v3714_v47  ;;  %v3650_v47 = vor.u32 %v4138_v36, %v3649_v35  ;;  %v3059_v35 = vld [vmem:[#allocation7 + $0x278] sm:$0xf0]  ;;  %v4020_v38 = vld [vmem:[#allocation7 + $0x36c] sm:$0xf] }
 0x123   :  { %2182 = vmatpush.bf16.msrb.mxu0 %v3298_v52  ;;  %2195 = vmatpush.bf16.msrb.mxu1 %v3426_v26  ;;  %v2963_v52 = vld [vmem:[#allocation7 + $0x1b8] sm:$0xf0]  ;;  %v3916_v42 = vld [vmem:[#allocation7 + $0x2c] sm:$0xf] }
 0x124   :  { %v3107_v26 = vld [vmem:[#allocation7 + $0x2d8] sm:$0xf0]  ;;  %v2966_v59 = vor.u32 %v3964_v50, %v2963_v52 }
 0x125   :  { %2207 = vmatpush.bf16.msrb.mxu2 %v3570_v58  ;;  %v3235_v58 = vld [vmem:[#allocation7 + $0x3d8] sm:$0xf0]  ;;  %v3110_v62 = vor.u32 %v4000_v54, %v3107_v26  ;;  %v4016_v54 = vld [vmem:[#allocation7 + $0x34c] sm:$0xf] }
 0x126   :  { %2220 = vmatpush.bf16.msrb.mxu3 %v3698_v61  ;;  %v2819_v61 = vld [vmem:[#allocation7 + $0x98] sm:$0xf0]  ;;  %v3238_v2 = vor.u32 %v4032_v57, %v3235_v58  ;;  %v2902_v58 = vor.u32 %v3948_v45, %v2899_v46  ;;  %v4092_v46 = vld [vmem:[#allocation7 + $0x5ac] sm:$0xf] }
 0x127   :  { %2183 = vmatpush.bf16.msrb.mxu0 %v3282_v0  ;;  %2196 = vmatpush.bf16.msrb.mxu1 %v3410_v5  ;;  %v2947_v0 = vld [vmem:[#allocation7 + $0x198] sm:$0xf0]  ;;  %v2822_v7 = vor.u32 %v3928_v60, %v2819_v61  ;;  %v3944_v60 = vld [vmem:[#allocation7 + $0x10c] sm:$0xf] }
 0x128   :  { %v3091_v5 = vld [vmem:[#allocation7 + $0x2b8] sm:$0xf0]  ;;  %v2950_v11 = vor.u32 %v3960_v63, %v2947_v0  ;;  %v4068_v63 = vld [vmem:[#allocation7 + $0x4ec] sm:$0xf] }
 0x129   :  { %2208 = vmatpush.bf16.msrb.mxu2 %v3554_v10  ;;  %v4500_v1 = vpop.f32.mrf.mxu0  ;;  %v4503_v6 = vpop.f32.mrf.mxu1  ;;  %v3219_v10 = vld [vmem:[#allocation7 + $0x3b8] sm:$0xf0] }
 0x12a   :  { %2221 = vmatpush.bf16.msrb.mxu3 %v3682_v15  ;;  %v3094_v15 = vor.u32 %v3996_v4, %v3091_v5  ;;  %v3222_v18 = vor.u32 %v4028_v9, %v3219_v10  ;;  %v3043_v50 = vld [vmem:[#allocation7 + $0x258] sm:$0xf0]  ;;  %v3980_v9 = vld [vmem:[#allocation7 + $0x22c] sm:$0xf] }
 0x12b   :  { %2184 = vmatpush.bf16.msrb.mxu0 %v3266_v19  ;;  %2197 = vmatpush.bf16.msrb.mxu1 %v3394_v23  ;;  %v3992_v19 = vld [vmem:[#allocation7 + $0x28c] sm:$0xf]  ;;  %v3171_v26 = vld [vmem:[#allocation7 + $0x358] sm:$0xf0] }
 0x12c   :  { %v4024_v23 = vld [vmem:[#allocation7 + $0x38c] sm:$0xf]  ;;  %v3078_v28 = vor.u32 %v3992_v19, %v3075_v21  ;;  %v2883_v61 = vld [vmem:[#allocation7 + $0x118] sm:$0xf0]  ;;  %v3174_v5 = vor.u32 %v4016_v54, %v3171_v26 }
 0x12d   :  { %2209 = vmatpush.bf16.msrb.mxu2 %v3538_v27  ;;  %v2787_v27 = vld [vmem:[#allocation7 + $0x58] sm:$0xf0]  ;;  %v2886_v16 = vor.u32 %v3944_v60, %v2883_v61  ;;  %v4056_v60 = vld [vmem:[#allocation7 + $0x48c] sm:$0xf] }
 0x12e   :  { %2222 = vmatpush.bf16.msrb.mxu3 %v3666_v31  ;;  %2185 = vmatmul.bf16.vlgmr.msrb.gmra.mxu0 %v4474_v13  ;;  %v3379_v0 = vld [vmem:[#allocation7 + $0x4f8] sm:$0xf0] }
 0x12f   :  { %2229 = vmatpush.bf16.msra.mxu0 %v2870_v24  ;;  %2242 = vmatpush.bf16.msra.mxu1 %v2998_v51  ;;  %v3203_v24 = vld [vmem:[#allocation7 + $0x398] sm:$0xf0]  ;;  %v3920_v51 = vld [vmem:[#allocation7 + $0x4c] sm:$0xf]  ;;  %v3382_v17 = vor.u32 %v4068_v63, %v3379_v0 }
 0x130   :  { %2198 = vmatmul.bf16.vlgmr.msrb.gmra.mxu1 %v4476_v20  ;;  %v3206_v32 = vor.u32 %v4024_v23, %v3203_v24  ;;  %v2790_v37 = vor.u32 %v3920_v51, %v2787_v27  ;;  %v3027_v10 = vld [vmem:[#allocation7 + $0x238] sm:$0xf0]  ;;  %v4096_v23 = vld [vmem:[#allocation7 + $0x5cc] sm:$0xf] }
 0x131   :  { %2210 = vmatpush.bf16.msrb.mxu2 %v3522_v44  ;;  %v1928_v31 = vpop.f32.mrf.mxu0  ;;  %v1941_v36 = vpop.f32.mrf.mxu1  ;;  %v3062_v44 = vor.u32 %v3988_v33, %v3059_v35  ;;  %v3030_v21 = vor.u32 %v3980_v9, %v3027_v10  ;;  %v3491_v24 = vld [vmem:[#allocation7 + $0x5d8] sm:$0xf0]  ;;  %v3976_v51 = vld [vmem:[#allocation7 + $0x20c] sm:$0xf] }
 0x132   :  { %2223 = vmatpush.bf16.msrb.mxu3 %v3650_v47  ;;  %v3011_v27 = vld [vmem:[#allocation7 + $0x218] sm:$0xf0]  ;;  %v4132_v31 = vld [vmem:[#allocation7 + $0x6ec] sm:$0xf] }
 0x133   :  { %2230 = vmatpush.bf16.msra.mxu0 %v2854_v39  ;;  %2243 = vmatpush.bf16.msra.mxu1 %v2982_v43  ;;  %v3187_v39 = vld [vmem:[#allocation7 + $0x378] sm:$0xf0]  ;;  %v4164_v36 = vld [vmem:[#allocation7 + $0x7ec] sm:$0xf] }
 0x134   :  { %2211 = vmatmul.bf16.vlgmr.msrb.gmra.mxu2 %v4480_v48  ;;  %v2771_v43 = vld [vmem:[#allocation7 + $0x38] sm:$0xf0]  ;;  %v3190_v47 = vor.u32 %v4020_v38, %v3187_v39  ;;  %v3494_v38 = vor.u32 %v4096_v23, %v3491_v24  ;;  %v3014_v39 = vor.u32 %v3976_v51, %v3011_v27  ;;  %v4156_v10 = vld [vmem:[#allocation7 + $0x7ac] sm:$0xf] }
 0x135   :  { %2255 = vmatpush.bf16.msra.mxu2 %v3126_v49  ;;  %2224 = vmatmul.bf16.vlgmr.msrb.gmra.mxu3 %v4482_v55  ;;  %v3984_v49 = vld [vmem:[#allocation7 + $0x24c] sm:$0xf]  ;;  %v3619_v54 = vld [vmem:[#allocation7 + $0x6d8] sm:$0xf0] }
 0x136   :  { %2268 = vmatpush.bf16.msra.mxu3 %v3254_v53  ;;  %v2774_v53 = vor.u32 %v3916_v42, %v2771_v43  ;;  %v3347_v42 = vld [vmem:[#allocation7 + $0x4b8] sm:$0xf0]  ;;  %v4120_v23 = vld [vmem:[#allocation7 + $0x68c] sm:$0xf] }
 0x137   :  { %2231 = vmatpush.bf16.msra.mxu0 %v2838_v56  ;;  %2244 = vmatpush.bf16.msra.mxu1 %v2966_v59  ;;  %v4506_v52 = vpop.f32.mrf.mxu2  ;;  %v3912_v56 = vld [vmem:[#allocation7 + $0xc] sm:$0xf]  ;;  %v4508_v57 = vpop.f32.mrf.mxu3  ;;  %v2755_v59 = vld [vmem:[#allocation7 + $0x18] sm:$0xf0] }
 0x138   :  { %v2758_v12 = vor.u32 %v3912_v56, %v2755_v59  ;;  %v4160_v56 = vld [vmem:[#allocation7 + $0x7cc] sm:$0xf]  ;;  %v3459_v63 = vld [vmem:[#allocation7 + $0x598] sm:$0xf0] }
 0x139   :  { %2256 = vmatpush.bf16.msra.mxu2 %v3110_v62  ;;  %v3046_v62 = vor.u32 %v3984_v49, %v3043_v50  ;;  %v4152_v51 = vld [vmem:[#allocation7 + $0x78c] sm:$0xf] }
 0x13a   :  { %2269 = vmatpush.bf16.msra.mxu3 %v3238_v2  ;;  %v4100_v2 = vld [vmem:[#allocation7 + $0x5ec] sm:$0xf]  ;;  %v4510_v4 = vpop.f32.mrf.mxu0 }
 0x13b   :  { %2232 = vmatpush.bf16.msra.mxu0 %v2822_v7  ;;  %2245 = vmatpush.bf16.msra.mxu1 %v2950_v11  ;;  %v3507_v7 = vld [vmem:[#allocation7 + $0x5f8] sm:$0xf0]  ;;  %v4512_v11 = vpop.f32.mrf.mxu1 }
 0x13c   :  { %v3510_v19 = vor.u32 %v4100_v2, %v3507_v7  ;;  %v4124_v2 = vld [vmem:[#allocation7 + $0x6ac] sm:$0xf] }
 0x13d   :  { %2257 = vmatpush.bf16.msra.mxu2 %v3094_v15  ;;  %v3155_v15 = vld [vmem:[#allocation7 + $0x338] sm:$0xf0] }
 0x13e   :  { %2270 = vmatpush.bf16.msra.mxu3 %v3222_v18  ;;  %v4064_v18 = vld [vmem:[#allocation7 + $0x4cc] sm:$0xf] }
 0x13f   :  { %2233 = vmatpush.bf16.msra.mxu0 %v2806_v22  ;;  %2246 = vmatpush.bf16.msra.mxu1 %v2934_v25  ;;  %v3363_v22 = vld [vmem:[#allocation7 + $0x4d8] sm:$0xf0]  ;;  %v3158_v25 = vor.u32 %v4012_v14, %v3155_v15  ;;  %v1954_v29 = vpop.f32.mrf.mxu2  ;;  %v1967_v33 = vpop.f32.mrf.mxu3  ;;  %v4052_v15 = vld [vmem:[#allocation7 + $0x46c] sm:$0xf] }
 0x140   :  { %v3366_v35 = vor.u32 %v4064_v18, %v3363_v22  ;;  %v4084_v18 = vld [vmem:[#allocation7 + $0x56c] sm:$0xf]  ;;  %v3299_v29 = vld [vmem:[#allocation7 + $0x458] sm:$0xf0] }
 0x141   :  { %2258 = vmatpush.bf16.msra.mxu2 %v3078_v28  ;;  %v4008_v28 = vld [vmem:[#allocation7 + $0x30c] sm:$0xf] }
 0x142   :  { %2271 = vmatpush.bf16.msra.mxu3 %v3206_v32  ;;  %v3635_v32 = vld [vmem:[#allocation7 + $0x6f8] sm:$0xf0]  ;;  %v1980_v43 = vpop.f32.mrf.mxu0 }
 0x143   :  { %2234 = vmatpush.bf16.msra.mxu0 %v2790_v37  ;;  %2247 = vmatpush.bf16.msra.mxu1 %v2918_v40  ;;  %v3763_v37 = vld [vmem:[#allocation7 + $0x7f8] sm:$0xf0]  ;;  %v4060_v40 = vld [vmem:[#allocation7 + $0x4ac] sm:$0xf]  ;;  %v3638_v45 = vor.u32 %v4132_v31, %v3635_v32  ;;  %v1993_v49 = vpop.f32.mrf.mxu1 }
 0x144   :  { %v3766_v50 = vor.u32 %v4164_v36, %v3763_v37  ;;  %v3350_v26 = vor.u32 %v4060_v40, %v3347_v42  ;;  %v4080_v31 = vld [vmem:[#allocation7 + $0x54c] sm:$0xf]  ;;  %v3427_v32 = vld [vmem:[#allocation7 + $0x558] sm:$0xf0] }
 0x145   :  { %2259 = vmatpush.bf16.msra.mxu2 %v3062_v44  ;;  %v3142_v44 = vor.u32 %v4008_v28, %v3139_v30  ;;  %v4048_v28 = vld [vmem:[#allocation7 + $0x44c] sm:$0xf]  ;;  %v3571_v37 = vld [vmem:[#allocation7 + $0x678] sm:$0xf0] }
 0x146   :  { %2272 = vmatpush.bf16.msra.mxu3 %v3190_v47  ;;  %v3475_v47 = vld [vmem:[#allocation7 + $0x5b8] sm:$0xf0]  ;;  %v4116_v36 = vld [vmem:[#allocation7 + $0x66c] sm:$0xf]  ;;  %v3302_v40 = vor.u32 %v4048_v28, %v3299_v29 }
 0x147   :  { %2235 = vmatpush.bf16.msra.mxu0 %v2774_v53  ;;  %2248 = vmatpush.bf16.msra.mxu1 %v2902_v58  ;;  %v4128_v53 = vld [vmem:[#allocation7 + $0x6cc] sm:$0xf]  ;;  %v3747_v58 = vld [vmem:[#allocation7 + $0x7d8] sm:$0xf0]  ;;  %v3478_v59 = vor.u32 %v4092_v46, %v3475_v47  ;;  %v4518_v7 = vpop.f32.mrf.mxu3  ;;  %v3574_v47 = vor.u32 %v4116_v36, %v3571_v37 }
 0x148   :  { %v3622_v61 = vor.u32 %v4128_v53, %v3619_v54  ;;  %v3750_v0 = vor.u32 %v4160_v56, %v3747_v58  ;;  %v4148_v42 = vld [vmem:[#allocation7 + $0x76c] sm:$0xf]  ;;  %v3699_v43 = vld [vmem:[#allocation7 + $0x778] sm:$0xf0] }
 0x149   :  { %2260 = vmatpush.bf16.msra.mxu2 %v3046_v62  ;;  %v4088_v62 = vld [vmem:[#allocation7 + $0x58c] sm:$0xf]  ;;  %v3283_v46 = vld [vmem:[#allocation7 + $0x438] sm:$0xf0] }
 0x14a   :  { %2273 = vmatpush.bf16.msra.mxu3 %v3174_v5  ;;  %v3603_v5 = vld [vmem:[#allocation7 + $0x6b8] sm:$0xf0]  ;;  %v3462_v14 = vor.u32 %v4088_v62, %v3459_v63  ;;  %v4076_v49 = vld [vmem:[#allocation7 + $0x52c] sm:$0xf] }
 0x14b   :  { %2236 = vmatpush.bf16.msra.mxu0 %v2758_v12  ;;  %2249 = vmatpush.bf16.msra.mxu1 %v2886_v16  ;;  %v3731_v12 = vld [vmem:[#allocation7 + $0x7b8] sm:$0xf0]  ;;  %v4112_v56 = vld [vmem:[#allocation7 + $0x64c] sm:$0xf] }
 0x14c   :  { %v3315_v16 = vld [vmem:[#allocation7 + $0x478] sm:$0xf0]  ;;  %v3734_v22 = vor.u32 %v4156_v10, %v3731_v12  ;;  %v4040_v63 = vld [vmem:[#allocation7 + $0x40c] sm:$0xf] }
 0x14d   :  { %2261 = vmatpush.bf16.msra.mxu2 %v3030_v21  ;;  %v4522_v21 = vpop.f32.mrf.mxu0  ;;  %v4524_v24 = vpop.f32.mrf.mxu1  ;;  %v3555_v58 = vld [vmem:[#allocation7 + $0x658] sm:$0xf0]  ;;  %v4136_v29 = vld [vmem:[#allocation7 + $0x70c] sm:$0xf] }
 0x14e   :  { %2274 = vmatpush.bf16.msra.mxu3 %v3158_v25  ;;  %2237 = vmatmul.bf16.vlgmr.msra.gmra.mxu0 %v4458_v3  ;;  %v3331_v3 = vld [vmem:[#allocation7 + $0x498] sm:$0xf0]  ;;  %v3318_v25 = vor.u32 %v4052_v15, %v3315_v16 }
 0x14f   :  { %2281 = vmatpush.bf16.msrb.mxu0 %v3382_v17  ;;  %2294 = vmatpush.bf16.msrb.mxu1 %v3510_v19  ;;  %v3334_v9 = vor.u32 %v4056_v60, %v3331_v3  ;;  %v3606_v17 = vor.u32 %v4124_v2, %v3603_v5  ;;  %v3443_v19 = vld [vmem:[#allocation7 + $0x578] sm:$0xf0]  ;;  %v4144_v3 = vld [vmem:[#allocation7 + $0x74c] sm:$0xf]  ;;  %v3558_v2 = vor.u32 %v4112_v56, %v3555_v58 }
 0x150   :  { %2250 = vmatmul.bf16.vlgmr.msra.gmra.mxu1 %v4460_v8  ;;  %v4516_v8 = vpop.f32.mrf.mxu2  ;;  %v3446_v27 = vor.u32 %v4084_v18, %v3443_v19  ;;  %v4072_v5 = vld [vmem:[#allocation7 + $0x50c] sm:$0xf]  ;;  %v3539_v15 = vld [vmem:[#allocation7 + $0x638] sm:$0xf0] }
 0x151   :  { %2262 = vmatpush.bf16.msra.mxu2 %v3014_v39  ;;  %v2019_v39 = vpop.f32.mrf.mxu3  ;;  %v4140_v19 = vld [vmem:[#allocation7 + $0x72c] sm:$0xf]  ;;  %v3523_v28 = vld [vmem:[#allocation7 + $0x618] sm:$0xf0] }
 0x152   :  { %2275 = vmatpush.bf16.msra.mxu3 %v3142_v44  ;;  %v3430_v44 = vor.u32 %v4080_v31, %v3427_v32  ;;  %v4173_v32 = vld [vmem:[#allocation10 + $0x30] sm:$0xff]  ;;  %v4176_v58 = vld [vmem:[#allocation10 + $0x48] sm:$0xff] }
 0x153   :  { %2282 = vmatpush.bf16.msrb.mxu0 %v3366_v35  ;;  %2295 = vmatpush.bf16.msrb.mxu1 %v3494_v38  ;;  %v4526_v38 = vld [vmem:[#allocation9] sm:$0xf] }
 0x154   :  { %2263 = vmatmul.bf16.vlgmr.msra.gmra.mxu2 %v4466_v34  ;;  %v3587_v34 = vld [vmem:[#allocation7 + $0x698] sm:$0xf0]  ;;  %v629_v53 = vperm.slane %v4526_v38, 0  ;;  %v630_v36 = vperm.slane %v4526_v38, 1 }
 0x155   :  { %2307 = vmatpush.bf16.msrb.mxu2 %v3638_v45  ;;  %2276 = vmatmul.bf16.vlgmr.msra.gmra.mxu3 %v4468_v41  ;;  %v3715_v41 = vld [vmem:[#allocation7 + $0x798] sm:$0xf0]  ;;  %v3590_v30 = vor.u32 %v4120_v23, %v3587_v34  ;;  %v4044_v45 = vld [vmem:[#allocation7 + $0x42c] sm:$0xf]  ;;  %v2032_v54 = vpop.f32.mrf.mxu0 }
 0x156   :  { %2320 = vmatpush.bf16.msrb.mxu3 %v3766_v50  ;;  %v3718_v35 = vor.u32 %v4152_v51, %v3715_v41  ;;  %v3411_v50 = vld [vmem:[#allocation7 + $0x538] sm:$0xf0]  ;;  %v3286_v60 = vor.u32 %v4044_v45, %v3283_v46  ;;  %v1927_v10 = vadd.f32 %v4500_v1, %v629_v53  ;;  %v4169_v53 = vld [vmem:[#allocation10 + $0x10] sm:$0xff] }
 0x157   :  { %2283 = vmatpush.bf16.msrb.mxu0 %v3350_v26  ;;  %2296 = vmatpush.bf16.msrb.mxu1 %v3478_v59  ;;  %v3702_v26 = vor.u32 %v4148_v42, %v3699_v43  ;;  %v2045_v59 = vpop.f32.mrf.mxu1  ;;  %v3414_v62 = vor.u32 %v4076_v49, %v3411_v50  ;;  %v4174_v34 = vld [vmem:[#allocation10 + $0x38] sm:$0xff]  ;;  %v4180_v42 = vld [vmem:[#allocation10 + $0x68] sm:$0xff]  ;;  %v2031_v43 = vadd.f32 %v4522_v21, %v630_v36 }
 0x158   :  { %v2006_v33 = vpop.f32.mrf.mxu2  ;;  %v4182_v51 = vld [vmem:[#allocation10 + $0x78] sm:$0xff]  ;;  %v1940_v41 = vadd.f32 %v4503_v6, %v1927_v10  ;;  %v4189_v10 = vld [vmem:[#allocation10 + $0xb0] sm:$0xff] }
 0x159   :  { %2308 = vmatpush.bf16.msrb.mxu2 %v3622_v61  ;;  %v3683_v61 = vld [vmem:[#allocation7 + $0x758] sm:$0xf0] }
 0x15a   :  { %2321 = vmatpush.bf16.msrb.mxu3 %v3750_v0  ;;  %v3267_v0 = vld [vmem:[#allocation7 + $0x418] sm:$0xf0]  ;;  %v3686_v12 = vor.u32 %v4144_v3, %v3683_v61  ;;  %v1953_v31 = vadd.f32 %v4506_v52, %v1940_v41  ;;  %v4172_v52 = vld [vmem:[#allocation10 + $0x28] sm:$0xff] }
 0x15b   :  { %2284 = vmatpush.bf16.msrb.mxu0 %v3334_v9  ;;  %2297 = vmatpush.bf16.msrb.mxu1 %v3462_v14  ;;  %v3395_v9 = vld [vmem:[#allocation7 + $0x518] sm:$0xf0]  ;;  %v4108_v14 = vld [vmem:[#allocation7 + $0x62c] sm:$0xf]  ;;  %v3270_v18 = vor.u32 %v4040_v63, %v3267_v0  ;;  %v4175_v63 = vld [vmem:[#allocation10 + $0x40] sm:$0xff] }
 0x15c   :  { %v3398_v23 = vor.u32 %v4072_v5, %v3395_v9  ;;  %v4170_v21 = vld [vmem:[#allocation10 + $0x18] sm:$0xff]  ;;  %v4184_v41 = vld [vmem:[#allocation10 + $0x88] sm:$0xff] }
 0x15d   :  { %2309 = vmatpush.bf16.msrb.mxu2 %v3606_v17  ;;  %v2069_v17 = vpop.f32.mrf.mxu3  ;;  %v4178_v50 = vld [vmem:[#allocation10 + $0x58] sm:$0xff] }
 0x15e   :  { %2322 = vmatpush.bf16.msrb.mxu3 %v3734_v22  ;;  %v3667_v22 = vld [vmem:[#allocation7 + $0x738] sm:$0xf0] }
 0x15f   :  { %2285 = vmatpush.bf16.msrb.mxu0 %v3318_v25  ;;  %2298 = vmatpush.bf16.msrb.mxu1 %v3446_v27  ;;  %v3542_v25 = vor.u32 %v4108_v14, %v3539_v15  ;;  %v3670_v1 = vor.u32 %v4140_v19, %v3667_v22  ;;  %v4104_v27 = vld [vmem:[#allocation7 + $0x60c] sm:$0xf] }
 0x160   :  { %v2056_v16 = vpop.f32.mrf.mxu2  ;;  %v3526_v33 = vor.u32 %v4104_v27, %v3523_v28  ;;  %v4183_v28 = vld [vmem:[#allocation10 + $0x80] sm:$0xff] }
 0x161   :  { %2310 = vmatpush.bf16.msrb.mxu2 %v3590_v30  ;;  %v3651_v30 = vld [vmem:[#allocation7 + $0x718] sm:$0xf0] }
 0x162   :  { %2323 = vmatpush.bf16.msrb.mxu3 %v3718_v35  ;;  %v4181_v35 = vld [vmem:[#allocation10 + $0x70] sm:$0xff]  ;;  %v3654_v6 = vor.u32 %v4136_v29, %v3651_v30  ;;  %v631_v29 = vperm.slane %v4526_v38, 2 }
 0x163   :  { %2286 = vmatpush.bf16.msrb.mxu0 %v3302_v40  ;;  %2299 = vmatpush.bf16.msrb.mxu1 %v3430_v44  ;;  %v1966_v40 = vadd.f32 %v4508_v57, %v1953_v31  ;;  %v2044_v57 = vadd.f32 %v4524_v24, %v2031_v43 }
 0x165   :  { %2311 = vmatpush.bf16.msrb.mxu2 %v3574_v47  ;;  %v2071_v39 = vpop.f32.mrf.mxu3  ;;  %v1979_v44 = vadd.f32 %v4510_v4, %v1966_v40  ;;  %v2057_v47 = vadd.f32 %v2056_v16, %v2044_v57  ;;  %v4198_v57 = vld [vmem:[#allocation10 + $0xf8] sm:$0xff] }
 0x166   :  { %2324 = vmatpush.bf16.msrb.mxu3 %v3702_v26 }
 0x167   :  { %2287 = vmatpush.bf16.msrb.mxu0 %v3286_v60  ;;  %2300 = vmatpush.bf16.msrb.mxu1 %v3414_v62  ;;  %v1992_v46 = vadd.f32 %v4512_v11, %v1979_v44  ;;  %v4168_v11 = vld [vmem:[#allocation10 + $0x8] sm:$0xff]  ;;  %v4167_v62 = vld [vmem:[#allocation10] sm:$0xff] }
 0x168   :  { %v2058_v37 = vpop.f32.mrf.mxu2 }
 0x169   :  { %2312 = vmatpush.bf16.msrb.mxu2 %v3558_v2  ;;  %v2005_v4 = vadd.f32 %v4516_v8, %v1992_v46  ;;  %v4197_v46 = vld [vmem:[#allocation10 + $0xf0] sm:$0xff] }
 0x16a   :  { %2325 = vmatpush.bf16.msrb.mxu3 %v3686_v12 }
 0x16b   :  { %2288 = vmatpush.bf16.msrb.mxu0 %v3270_v18  ;;  %2301 = vmatpush.bf16.msrb.mxu1 %v3398_v23  ;;  %v2082_v45 = vpop.f32.mrf.mxu0  ;;  %v2018_v54 = vadd.f32 %v4518_v7, %v2005_v4  ;;  %v4190_v7 = vld [vmem:[#allocation10 + $0xb8] sm:$0xff]  ;;  %v4187_v18 = vld [vmem:[#allocation10 + $0xa0] sm:$0xff]  ;;  %v4196_v4 = vld [vmem:[#allocation10 + $0xe8] sm:$0xff] }
 0x16c   :  { %v4186_v23 = vld [vmem:[#allocation10 + $0x98] sm:$0xff] }
 0x16d   :  { %2313 = vmatpush.bf16.msrb.mxu2 %v3542_v25  ;;  %v2095_v49 = vpop.f32.mrf.mxu1  ;;  %v2337_v59 = vmul.f32 0.25, %v2018_v54  ;;  %vm2333_vm9 = vcmp.gt.f32.partialorder %v2018_v54, 0.0 }
 0x16e   :  { %2326 = vmatpush.bf16.msrb.mxu3 %v3670_v1  ;;  %2289 = vmatmul.bf16.vlgmr.msrb.gmra.mxu0 %v4474_v13  ;;  %v4171_v13 = vld [vmem:[#allocation10 + $0x20] sm:$0xff] }
 0x16f   :  { %2609 = vmatpush.bf16.msra.mxu0 %v4174_v34  ;;  %2622 = vmatpush.bf16.msra.mxu1 %v4182_v51  ;;  %v2341_v0 = vsel %vm2333_vm9, %v2018_v54, %v2337_v59  ;;  %v4185_v34 = vld [vmem:[#allocation10 + $0x90] sm:$0xff]  ;;  %v4194_v54 = vld [vmem:[#allocation10 + $0xd8] sm:$0xff] }
 0x170   :  { %2302 = vmatmul.bf16.vlgmr.msrb.gmra.mxu1 %v4476_v20  ;;  %v4179_v20 = vld [vmem:[#allocation10 + $0x60] sm:$0xff]  ;;  %v2345_v9 = vpack.c.bf16 %v2341_v0, %v2341_v0 }
 0x171   :  { %2314 = vmatpush.bf16.msrb.mxu2 %v3526_v33 }
 0x172   :  { %2327 = vmatpush.bf16.msrb.mxu3 %v3654_v6 }
 0x173   :  { %2610 = vmatpush.bf16.msra.mxu0 %v4173_v32  ;;  %2623 = vmatpush.bf16.msra.mxu1 %v4181_v35  ;;  %v2084_v24 = vpop.f32.mrf.mxu0 }
 0x174   :  { %2315 = vmatmul.bf16.vlgmr.msrb.gmra.mxu2 %v4480_v48  ;;  %v2070_v48 = vadd.f32 %v2069_v17, %v2057_v47  ;;  %v4188_v17 = vld [vmem:[#allocation10 + $0xa8] sm:$0xff] }
 0x175   :  { %2328 = vmatmul.bf16.vlgmr.msrb.gmra.mxu3 %v4482_v55  ;;  %v4177_v55 = vld [vmem:[#allocation10 + $0x50] sm:$0xff]  ;;  %v2097_v56 = vpop.f32.mrf.mxu1  ;;  %2635 = vmatpush.bf16.msra.mxu2 %v4190_v7 }
 0x176   :  { %v2083_v26 = vadd.f32 %v2082_v45, %v2070_v48  ;;  %2648 = vmatpush.bf16.msra.mxu3 %v4198_v57  ;;  %v4195_v48 = vld [vmem:[#allocation10 + $0xe0] sm:$0xff] }
 0x177   :  { %2611 = vmatpush.bf16.msra.mxu0 %v4172_v52  ;;  %2624 = vmatpush.bf16.msra.mxu1 %v4180_v42  ;;  %v2108_v3 = vpop.f32.mrf.mxu2 }
 0x178   :  { %v2096_v60 = vadd.f32 %v2095_v49, %v2083_v26  ;;  %v2121_v8 = vpop.f32.mrf.mxu3  ;;  %v4193_v26 = vld [vmem:[#allocation10 + $0xd0] sm:$0xff] }
 0x179   :  { %2636 = vmatpush.bf16.msra.mxu2 %v4189_v10 }
 0x17a   :  { %v2109_v61 = vadd.f32 %v2108_v3, %v2096_v60  ;;  %2649 = vmatpush.bf16.msra.mxu3 %v4197_v46  ;;  %v4191_v60 = vld [vmem:[#allocation10 + $0xc0] sm:$0xff]  ;;  %v632_v3 = vperm.slane %v4526_v38, 3 }
 0x17b   :  { %2612 = vmatpush.bf16.msra.mxu0 %v4171_v13  ;;  %2625 = vmatpush.bf16.msra.mxu1 %v4179_v20 }
 0x17c   :  { %v2122_v2 = vadd.f32 %v2121_v8, %v2109_v61 }
 0x17d   :  { %2637 = vmatpush.bf16.msra.mxu2 %v4188_v17 }
 0x17e   :  { %vm2334_vm10 = vcmp.gt.f32.partialorder %v2122_v2, 0.0  ;;  %v2338_v5 = vmul.f32 0.25, %v2122_v2  ;;  %2650 = vmatpush.bf16.msra.mxu3 %v4196_v4 }
 0x17f   :  { %2613 = vmatpush.bf16.msra.mxu0 %v4170_v21  ;;  %2626 = vmatpush.bf16.msra.mxu1 %v4178_v50  ;;  %v2110_v15 = vpop.f32.mrf.mxu2 }
 0x180   :  { %v2342_v12 = vsel %vm2334_vm10, %v2122_v2, %v2338_v5  ;;  %v2123_v16 = vpop.f32.mrf.mxu3 }
 0x181   :  { %v2346_v14 = vpack.c.bf16 %v2342_v12, %v2342_v12  ;;  %2638 = vmatpush.bf16.msra.mxu2 %v4187_v18 }
 0x182   :  { %2651 = vmatpush.bf16.msra.mxu3 %v4195_v48 }
 0x183   :  { %2614 = vmatpush.bf16.msra.mxu0 %v4169_v53  ;;  %2627 = vmatpush.bf16.msra.mxu1 %v4177_v55 }
 0x185   :  { %2639 = vmatpush.bf16.msra.mxu2 %v4186_v23 }
 0x186   :  { %2652 = vmatpush.bf16.msra.mxu3 %v4194_v54 }
 0x187   :  { %2615 = vmatpush.bf16.msra.mxu0 %v4168_v11  ;;  %2628 = vmatpush.bf16.msra.mxu1 %v4176_v58  ;;  %v4192_v11 = vld [vmem:[#allocation10 + $0xc8] sm:$0xff] }
 0x189   :  { %2640 = vmatpush.bf16.msra.mxu2 %v4185_v34 }
 0x18a   :  { %2653 = vmatpush.bf16.msra.mxu3 %v4193_v26 }
 0x18b   :  { %2616 = vmatpush.bf16.msra.mxu0 %v4167_v62  ;;  %2629 = vmatpush.bf16.msra.mxu1 %v4175_v63  ;;  %v2134_v19 = vpop.f32.mrf.mxu0 }
 0x18c   :  { %v2135_v32 = vadd.f32 %v2134_v19, %v631_v29 }
 0x18d   :  { %v2147_v22 = vpop.f32.mrf.mxu1  ;;  %2641 = vmatpush.bf16.msra.mxu2 %v4184_v41 }
 0x18e   :  { %2617 = vmatmul.bf16.vlgmr.msra.gmra.mxu0 %v2345_v9  ;;  %2630 = vmatmul.bf16.vlgmr.msra.gmra.mxu1 %v2346_v14  ;;  %v2148_v33 = vadd.f32 %v2147_v22, %v2135_v32 }
 0x18f   :  { %2654 = vmatpush.bf16.msra.mxu3 %v4192_v11 }
 0x191   :  { %2642 = vmatpush.bf16.msra.mxu2 %v4183_v28 }
 0x193   :  { %v2136_v25 = vpop.f32.mrf.mxu0  ;;  %2655 = vmatpush.bf16.msra.mxu3 %v4191_v60 }
 0x194   :  { %v4211_v25 = vld [vmem:[%s4558_s6] ss:$0 sm:$0xff] }
 0x195   :  { %v2149_v51 = vpop.f32.mrf.mxu1 }
 0x197   :  { %v2160_v1 = vpop.f32.mrf.mxu2 }
 0x198   :  { %v2173_v27 = vpop.f32.mrf.mxu3  ;;  %v2161_v36 = vadd.f32 %v2160_v1, %v2148_v33 }
 0x19a   :  { %v2174_v37 = vadd.f32 %v2173_v27, %v2161_v36 }
 0x19f   :  { %v2162_v30 = vpop.f32.mrf.mxu2 }
 0x1a0   :  { %v2175_v31 = vpop.f32.mrf.mxu3 }
 0x1ab   :  { %v2186_v35 = vpop.f32.mrf.mxu0 }
 0x1ac   :  { %v2187_v39 = vadd.f32 %v2186_v35, %v2174_v37 }
 0x1ad   :  { %v2199_v6 = vpop.f32.mrf.mxu1 }
 0x1ae   :  { %v2200_v42 = vadd.f32 %v2199_v6, %v2187_v39 }
 0x1b3   :  { %v2188_v40 = vpop.f32.mrf.mxu0 }
 0x1b5   :  { %v2201_v52 = vpop.f32.mrf.mxu1 }
 0x1b7   :  { %v2212_v43 = vpop.f32.mrf.mxu2 }
 0x1b8   :  { %v2213_v44 = vadd.f32 %v2212_v43, %v2200_v42  ;;  %v2225_v13 = vpop.f32.mrf.mxu3 }
 0x1ba   :  { %v2226_v20 = vadd.f32 %v2225_v13, %v2213_v44 }
 0x1bc   :  { %vm2335_vm11 = vcmp.gt.f32.partialorder %v2226_v20, 0.0  ;;  %v2339_v45 = vmul.f32 0.25, %v2226_v20 }
 0x1be   :  { %v2343_v47 = vsel %vm2335_vm11, %v2226_v20, %v2339_v45 }
 0x1bf   :  { %v2347_v49 = vpack.c.bf16 %v2343_v47, %v2343_v47  ;;  %v2214_v21 = vpop.f32.mrf.mxu2 }
 0x1c0   :  { %v2227_v50 = vpop.f32.mrf.mxu3 }
 0x1c1   :  { %2643 = vmatmul.bf16.vlgmr.msra.gmra.mxu2 %v2347_v49 }
 0x1cb   :  { %v2238_v53 = vpop.f32.mrf.mxu0 }
 0x1cc   :  { %v2239_v62 = vadd.f32 %v2238_v53, %v632_v3 }
 0x1cd   :  { %v2251_v55 = vpop.f32.mrf.mxu1 }
 0x1ce   :  { %v2252_v63 = vadd.f32 %v2251_v55, %v2239_v62 }
 0x1d3   :  { %v2240_v24 = vpop.f32.mrf.mxu0 }
 0x1d5   :  { %v2253_v56 = vpop.f32.mrf.mxu1 }
 0x1d7   :  { %v2264_v58 = vpop.f32.mrf.mxu2 }
 0x1d8   :  { %v2277_v59 = vpop.f32.mrf.mxu3  ;;  %v2265_v2 = vadd.f32 %v2264_v58, %v2252_v63 }
 0x1da   :  { %v2278_v5 = vadd.f32 %v2277_v59, %v2265_v2 }
 0x1df   :  { %v2266_v61 = vpop.f32.mrf.mxu2 }
 0x1e0   :  { %v2279_v8 = vpop.f32.mrf.mxu3 }
 0x1eb   :  { %v2290_v0 = vpop.f32.mrf.mxu0 }
 0x1ec   :  { %v2291_v9 = vadd.f32 %v2290_v0, %v2278_v5 }
 0x1ed   :  { %v2303_v7 = vpop.f32.mrf.mxu1 }
 0x1ee   :  { %v2304_v14 = vadd.f32 %v2303_v7, %v2291_v9 }
 0x1f3   :  { %v2292_v10 = vpop.f32.mrf.mxu0 }
 0x1f5   :  { %v2305_v12 = vpop.f32.mrf.mxu1 }
 0x1f7   :  { %v2316_v15 = vpop.f32.mrf.mxu2 }
 0x1f8   :  { %v2317_v16 = vadd.f32 %v2316_v15, %v2304_v14  ;;  %v2329_v17 = vpop.f32.mrf.mxu3 }
 0x1fa   :  { %v2330_v18 = vadd.f32 %v2329_v17, %v2317_v16 }
 0x1fc   :  { %vm2336_vm12 = vcmp.gt.f32.partialorder %v2330_v18, 0.0  ;;  %v2340_v19 = vmul.f32 0.25, %v2330_v18 }
 0x1fe   :  { %v2344_v22 = vsel %vm2336_vm12, %v2330_v18, %v2340_v19 }
 0x1ff   :  { %v2348_v38 = vpack.c.bf16 %v2344_v22, %v2344_v22  ;;  %v2318_v23 = vpop.f32.mrf.mxu2 }
 0x200   :  { %v2331_v34 = vpop.f32.mrf.mxu3 }
 0x201   :  { %2656 = vmatmul.bf16.vlgmr.msra.gmra.mxu3 %v2348_v38 }
 0x20b   :  { %v2618_v51 = vpop.f32.mrf.mxu0  ;;  %v2631_v1 = vpop.f32.mrf.mxu1 }
 0x20c   :  { %v2619_v41 = vadd.f32 %v4211_v25, %v2618_v51 }
 0x20e   :  { %v2632_v27 = vadd.f32 %v2631_v1, %v2619_v41 }
 0x213   :  { %v2620_v28 = vpop.f32.mrf.mxu0  ;;  %v2633_v29 = vpop.f32.mrf.mxu1 }
 0x244   :  { %v2644_v30 = vpop.f32.mrf.mxu2 }
 0x245   :  { %v2645_v32 = vadd.f32 %v2644_v30, %v2632_v27 }
 0x24c   :  { %v2646_v31 = vpop.f32.mrf.mxu2 }
 0x284   :  { %v2657_v33 = vpop.f32.mrf.mxu3 }
 0x285   :  { %v2658_v35 = vadd.f32 %v2657_v33, %v2645_v32 }
 0x287   :  { %v2661_v36 = vpack.c.bf16 %v2658_v35, %v2658_v35 }
 0x289   :  { %2662 = vst [vmem:[%s4559_s7] sm:$0xf] %v2661_v36 }
 0x28c   :  { %v2659_v6 = vpop.f32.mrf.mxu3 }
 0x28d   :  { %2667 = vsyncpa [#allocation3], 1 }
 0x28e   :  { %2668 = vsyncpa [#allocation5], 1 }
 0x28f   :  { %2669 = vsyncpa [#allocation8], 1 }
 0x290   :  { %2670 = vsyncpa [#allocation11], 1 }

</bundles_post_ra>
